<compile_context>
chip_gen: v5e
topology: v5e:2x2
jax: 0.10.0
libtpu: 0.0.40
codegen_flags: <defaults>
</compile_context>

<pallas_src>
from functools import partial

import jax
import jax.numpy as jnp
from jax import lax
from jax.experimental import pallas as pl
from jax.experimental.pallas import tpu as pltpu

EPS = 1e-6


def _ipow(x, p):
    # x ** p for small positive integer p (matches torch's elementwise pow)
    y = x
    for _ in range(p - 1):
        y = y * x
    return y


def _stable_softplus(x):
    # log(1 + exp(x)) without log1p/logaddexp; stable for any x.
    return jnp.maximum(x, 0.0) + jnp.log(jnp.exp(-jnp.abs(x)) + 1.0)


# ------------------------- fused kernel --------------------------------------
def _fused_kernel(q_ref, k_ref, v_ref, wq_ref, wk_ref, wv_ref, sc_ref,
                  mask_ref, wp_ref, bp_ref, o_ref, *, focusing_factor):
    f32 = jnp.float32

    # ---- QKV projections (cross-attention: distinct source tensors) ---------
    q = jnp.dot(q_ref[0], wq_ref[...], preferred_element_type=f32)   # (N, C)
    k = jnp.dot(k_ref[0], wk_ref[...], preferred_element_type=f32)   # (M, C)
    v = jnp.dot(v_ref[0], wv_ref[...], preferred_element_type=f32)   # (M, C)

    # ---- focused kernel map: ReLU + eps, /softplus(scale), power-renorm -----
    inv_scale = pl.reciprocal(_stable_softplus(sc_ref[...]), approx=True)  # (1,C)
    q = (jnp.maximum(q, 0.0) + EPS) * inv_scale
    k = (jnp.maximum(k, 0.0) + EPS) * inv_scale

    def focus(x):
        n2 = jnp.sum(x * x, axis=-1, keepdims=True)            # ||x||^2
        xp = _ipow(x, focusing_factor)
        np2 = jnp.sum(xp * xp, axis=-1, keepdims=True)         # ||x^p||^2
        # xp / ||xp|| * ||x||  ==  xp * (||x|| * rsqrt(||xp||^2))
        return xp * (jnp.sqrt(n2) * lax.rsqrt(np2))

    q = focus(q)
    k = focus(k)

    # ---- per-head linear attention, lane-dense via block-diagonal mask ------
    # mask[c, d] = 1 iff channels c, d belong to the same head.
    head_mask = mask_ref[...]                                          # (C, C)

    ksum = jnp.sum(k, axis=0, keepdims=True)                           # (1, C)
    # denom[n, d] = sum_{c in head(d)} q[n, c] * ksum[c]   (per-head broadcast)
    denom = jnp.dot(q * ksum, head_mask, preferred_element_type=f32)   # (N, C)
    z = pl.reciprocal(denom + EPS, approx=True)                        # (N, C)

    # kv path (kv = k^T v per head); always the winning branch for these dims
    # and VMEM-cheap: only (C, C) + (N, C) intermediates.
    kv = lax.dot_general(k, v, (((0,), (0,)), ((), ())),
                         preferred_element_type=f32) * head_mask       # (C, C)
    x = jnp.dot(q, kv, preferred_element_type=f32) * z                 # (N, C)

    # NOTE: the PyTorch forward also builds a dwc (depthwise conv) feature_map
    # from v, but that result never feeds the returned tensor (dead code even
    # when add=True: the residual add uses q, not feature_map).
    # TODO(synk): add the (unused) dwc feature_map path if it ever gets consumed.

    # ---- output projection ---------------------------------------------------
    o_ref[0] = (jnp.dot(x, wp_ref[...], preferred_element_type=f32)
                + bp_ref[...]).astype(o_ref.dtype)


# ------------------------- wrapper --------------------------------------------
def cross_focused_linear_attention(query, key, value, H, W, params,
                                   num_heads=8, focusing_factor=3):
    B, N, C = query.shape
    _, M, _ = key.shape
    hd = C // num_heads
    dt = query.dtype

    # torch Linear weights are (out, in); kernel wants (in, out).
    wq_t = params["wq"].T
    wk_t = params["wk"].T
    wv_t = params["wv"].T
    wp_t = params["wproj"].T
    bp = params["bproj"].reshape(1, C)
    sc = params["scale"].reshape(1, C).astype(jnp.float32)

    # block-diagonal "same head" mask (C, C)
    head_mask = jnp.kron(jnp.eye(num_heads, dtype=jnp.float32),
                         jnp.ones((hd, hd), jnp.float32))

    fused = pl.pallas_call(
        partial(_fused_kernel, focusing_factor=focusing_factor),
        grid=(B,),
        in_specs=[
            pl.BlockSpec((1, N, C), lambda b: (b, 0, 0)),   # query
            pl.BlockSpec((1, M, C), lambda b: (b, 0, 0)),   # key
            pl.BlockSpec((1, M, C), lambda b: (b, 0, 0)),   # value
            pl.BlockSpec((C, C), lambda b: (0, 0)),         # Wq^T
            pl.BlockSpec((C, C), lambda b: (0, 0)),         # Wk^T
            pl.BlockSpec((C, C), lambda b: (0, 0)),         # Wv^T
            pl.BlockSpec((1, C), lambda b: (0, 0)),         # scale
            pl.BlockSpec((C, C), lambda b: (0, 0)),         # head mask
            pl.BlockSpec((C, C), lambda b: (0, 0)),         # Wproj^T
            pl.BlockSpec((1, C), lambda b: (0, 0)),         # bproj
        ],
        out_specs=pl.BlockSpec((1, N, C), lambda b: (b, 0, 0)),
        out_shape=jax.ShapeDtypeStruct((B, N, C), dt),
        compiler_params=pltpu.CompilerParams(
            dimension_semantics=("parallel",)),
    )
    return fused(query, key, value, wq_t, wk_t, wv_t, sc, head_mask, wp_t, bp)


# ------------------------- pure-JAX reference (sanity check) ------------------
def reference(query, key, value, params, num_heads=8, focusing_factor=3):
    B, N, C = query.shape
    _, M, _ = key.shape
    hd = C // num_heads
    q = query @ params["wq"].T
    k = key @ params["wk"].T
    v = value @ params["wv"].T
    scale = jax.nn.softplus(params["scale"].reshape(1, 1, C))
    q = (jax.nn.relu(q) + EPS) / scale
    k = (jax.nn.relu(k) + EPS) / scale
    qn = jnp.sqrt(jnp.sum(q * q, -1, keepdims=True))
    kn = jnp.sqrt(jnp.sum(k * k, -1, keepdims=True))
    q, k = _ipow(q, focusing_factor), _ipow(k, focusing_factor)
    q = q / jnp.sqrt(jnp.sum(q * q, -1, keepdims=True)) * qn
    k = k / jnp.sqrt(jnp.sum(k * k, -1, keepdims=True)) * kn

    def to_heads(x, n):
        return x.reshape(B, n, num_heads, hd).transpose(0, 2, 1, 3).reshape(
            B * num_heads, n, hd)

    qh, kh, vh = to_heads(q, N), to_heads(k, M), to_heads(v, M)
    z = 1.0 / (jnp.einsum("bic,bc->bi", qh, kh.sum(1)) + EPS)
    if N * M * (2 * hd) > hd * hd * (N + M):
        kv = jnp.einsum("bjc,bjd->bcd", kh, vh)
        x = jnp.einsum("bic,bcd,bi->bid", qh, kv, z)
    else:
        qk = jnp.einsum("bic,bjc->bij", qh, kh)
        x = jnp.einsum("bij,bjd,bi->bid", qk, vh, z)
    x = x.reshape(B, num_heads, N, hd).transpose(0, 2, 1, 3).reshape(B, N, C)
    return x @ params["wproj"].T + params["bproj"]


if __name__ == "__main__":
    B, H, W, C, num_heads = 2, 8, 8, 64, 8
    N = H * W
    ks = jax.random.split(jax.random.PRNGKey(0), 8)
    query = jax.random.normal(ks[0], (B, N, C), jnp.float32)
    key_in = jax.random.normal(ks[1], (B, N, C), jnp.float32)
    value = jax.random.normal(ks[2], (B, N, C), jnp.float32)

    s = 1.0 / jnp.sqrt(jnp.float32(C))
    params = {
        "wq": jax.random.normal(ks[3], (C, C), jnp.float32) * s,   # torch Linear: (out, in)
        "wk": jax.random.normal(ks[4], (C, C), jnp.float32) * s,
        "wv": jax.random.normal(ks[5], (C, C), jnp.float32) * s,
        "wproj": jax.random.normal(ks[6], (C, C), jnp.float32) * s,
        "bproj": jax.random.normal(ks[7], (C,), jnp.float32) * 0.01,
        "scale": jnp.zeros((1, 1, C), jnp.float32),                # matches torch init (zeros)
    }

    out = cross_focused_linear_attention(query, key_in, value, H, W, params,
                                         num_heads=num_heads, focusing_factor=3)
    out = jax.block_until_ready(out)

    ref = reference(query, key_in, value, params, num_heads=num_heads,
                    focusing_factor=3)
    assert out.shape == (B, N, C)
    err = float(jnp.max(jnp.abs(out - ref)))
    assert jnp.allclose(out, ref, rtol=2e-2, atol=2e-2), f"max abs diff {err}"
    print("KERNEL_OK")
</pallas_src>

<mosaic_0001>
module attributes {stable_mosaic.version = 11 : i64} {
  func.func @_fused_kernel(%arg0: i32, %arg1: memref<1x64x64xf32, #tpu.memory_space<vmem>>, %arg2: memref<1x64x64xf32, #tpu.memory_space<vmem>>, %arg3: memref<1x64x64xf32, #tpu.memory_space<vmem>>, %arg4: memref<64x64xf32, #tpu.memory_space<vmem>>, %arg5: memref<64x64xf32, #tpu.memory_space<vmem>>, %arg6: memref<64x64xf32, #tpu.memory_space<vmem>>, %arg7: memref<1x64xf32, #tpu.memory_space<vmem>>, %arg8: memref<64x64xf32, #tpu.memory_space<vmem>>, %arg9: memref<64x64xf32, #tpu.memory_space<vmem>>, %arg10: memref<1x64xf32, #tpu.memory_space<vmem>>, %arg11: memref<1x64x64xf32, #tpu.memory_space<vmem>>) attributes {dimension_semantics = [#tpu.dimension_semantics<parallel>], iteration_bounds = array<i64: 2>, scalar_prefetch = 0 : i64, scratch_operands = 0 : i64, tpu.core_type = #tpu.core_type<tc>, window_params = [{transform_indices = @transform_0, window_bounds = array<i64: 1, 64, 64>}, {transform_indices = @transform_1, window_bounds = array<i64: 1, 64, 64>}, {transform_indices = @transform_2, window_bounds = array<i64: 1, 64, 64>}, {pipeline_mode = #tpu.pipeline_mode<synchronous>, transform_indices = @transform_3, window_bounds = array<i64: 64, 64>}, {pipeline_mode = #tpu.pipeline_mode<synchronous>, transform_indices = @transform_4, window_bounds = array<i64: 64, 64>}, {pipeline_mode = #tpu.pipeline_mode<synchronous>, transform_indices = @transform_5, window_bounds = array<i64: 64, 64>}, {pipeline_mode = #tpu.pipeline_mode<synchronous>, transform_indices = @transform_6, window_bounds = array<i64: 1, 64>}, {pipeline_mode = #tpu.pipeline_mode<synchronous>, transform_indices = @transform_7, window_bounds = array<i64: 64, 64>}, {pipeline_mode = #tpu.pipeline_mode<synchronous>, transform_indices = @transform_8, window_bounds = array<i64: 64, 64>}, {pipeline_mode = #tpu.pipeline_mode<synchronous>, transform_indices = @transform_9, window_bounds = array<i64: 1, 64>}, {transform_indices = @transform_10, window_bounds = array<i64: 1, 64, 64>}]} {
    %c0 = arith.constant 0 : index
    %c0_0 = arith.constant 0 : index
    %c0_1 = arith.constant 0 : index
    %0 = vector.load %arg1[%c0, %c0_0, %c0_1] : memref<1x64x64xf32, #tpu.memory_space<vmem>>, vector<1x64x64xf32>
    %1 = vector.shape_cast %0 : vector<1x64x64xf32> to vector<64x64xf32>
    %c0_2 = arith.constant 0 : index
    %c0_3 = arith.constant 0 : index
    %2 = vector.load %arg4[%c0_2, %c0_3] : memref<64x64xf32, #tpu.memory_space<vmem>>, vector<64x64xf32>
    %cst = arith.constant dense<0.000000e+00> : vector<64x64xf32>
    %3 = tpu.matmul %1, %2, %cst {dimension_numbers = #tpu.dot_dimension_numbers<[1], [0], [0], [1], [0, 0, 1, 1], [], []>} : vector<64x64xf32>, vector<64x64xf32>, vector<64x64xf32> -> vector<64x64xf32>
    %c0_4 = arith.constant 0 : index
    %c0_5 = arith.constant 0 : index
    %c0_6 = arith.constant 0 : index
    %4 = vector.load %arg2[%c0_4, %c0_5, %c0_6] : memref<1x64x64xf32, #tpu.memory_space<vmem>>, vector<1x64x64xf32>
    %5 = vector.shape_cast %4 : vector<1x64x64xf32> to vector<64x64xf32>
    %c0_7 = arith.constant 0 : index
    %c0_8 = arith.constant 0 : index
    %6 = vector.load %arg5[%c0_7, %c0_8] : memref<64x64xf32, #tpu.memory_space<vmem>>, vector<64x64xf32>
    %cst_9 = arith.constant dense<0.000000e+00> : vector<64x64xf32>
    %7 = tpu.matmul %5, %6, %cst_9 {dimension_numbers = #tpu.dot_dimension_numbers<[1], [0], [0], [1], [0, 0, 1, 1], [], []>} : vector<64x64xf32>, vector<64x64xf32>, vector<64x64xf32> -> vector<64x64xf32>
    %c0_10 = arith.constant 0 : index
    %c0_11 = arith.constant 0 : index
    %c0_12 = arith.constant 0 : index
    %8 = vector.load %arg3[%c0_10, %c0_11, %c0_12] : memref<1x64x64xf32, #tpu.memory_space<vmem>>, vector<1x64x64xf32>
    %9 = vector.shape_cast %8 : vector<1x64x64xf32> to vector<64x64xf32>
    %c0_13 = arith.constant 0 : index
    %c0_14 = arith.constant 0 : index
    %10 = vector.load %arg6[%c0_13, %c0_14] : memref<64x64xf32, #tpu.memory_space<vmem>>, vector<64x64xf32>
    %cst_15 = arith.constant dense<0.000000e+00> : vector<64x64xf32>
    %11 = tpu.matmul %9, %10, %cst_15 {dimension_numbers = #tpu.dot_dimension_numbers<[1], [0], [0], [1], [0, 0, 1, 1], [], []>} : vector<64x64xf32>, vector<64x64xf32>, vector<64x64xf32> -> vector<64x64xf32>
    %c0_16 = arith.constant 0 : index
    %c0_17 = arith.constant 0 : index
    %12 = vector.load %arg7[%c0_16, %c0_17] : memref<1x64xf32, #tpu.memory_space<vmem>>, vector<1x64xf32>
    %cst_18 = arith.constant 0.000000e+00 : f32
    %13 = vector.broadcast %cst_18 : f32 to vector<1x64xf32>
    %14 = arith.maximumf %12, %13 : vector<1x64xf32>
    %15 = math.absf %12 : vector<1x64xf32>
    %cst_19 = arith.constant 0.000000e+00 : f32
    %16 = vector.broadcast %cst_19 : f32 to vector<1x64xf32>
    %17 = arith.subf %16, %15 : vector<1x64xf32>
    %18 = math.exp %17 : vector<1x64xf32>
    %cst_20 = arith.constant 1.000000e+00 : f32
    %19 = vector.broadcast %cst_20 : f32 to vector<1x64xf32>
    %20 = arith.addf %18, %19 : vector<1x64xf32>
    %21 = math.log %20 : vector<1x64xf32>
    %22 = arith.addf %14, %21 : vector<1x64xf32>
    %23 = tpu.reciprocal %22 {approx = true} : vector<1x64xf32> -> vector<1x64xf32>
    %cst_21 = arith.constant 0.000000e+00 : f32
    %24 = vector.broadcast %cst_21 : f32 to vector<64x64xf32>
    %25 = arith.maximumf %3, %24 : vector<64x64xf32>
    %cst_22 = arith.constant 9.99999997E-7 : f32
    %26 = vector.broadcast %cst_22 : f32 to vector<64x64xf32>
    %27 = arith.addf %25, %26 : vector<64x64xf32>
    %28 = vector.broadcast %23 : vector<1x64xf32> to vector<64x64xf32>
    %29 = arith.mulf %27, %28 : vector<64x64xf32>
    %cst_23 = arith.constant 0.000000e+00 : f32
    %30 = vector.broadcast %cst_23 : f32 to vector<64x64xf32>
    %31 = arith.maximumf %7, %30 : vector<64x64xf32>
    %cst_24 = arith.constant 9.99999997E-7 : f32
    %32 = vector.broadcast %cst_24 : f32 to vector<64x64xf32>
    %33 = arith.addf %31, %32 : vector<64x64xf32>
    %34 = vector.broadcast %23 : vector<1x64xf32> to vector<64x64xf32>
    %35 = arith.mulf %33, %34 : vector<64x64xf32>
    %36 = arith.mulf %29, %29 : vector<64x64xf32>
    %cst_25 = arith.constant dense<0.000000e+00> : vector<64xf32>
    %37 = vector.multi_reduction <add>, %36, %cst_25 [1] : vector<64x64xf32> to vector<64xf32>
    %38 = vector.shape_cast %37 : vector<64xf32> to vector<64x1xf32>
    %39 = arith.mulf %29, %29 : vector<64x64xf32>
    %40 = arith.mulf %39, %29 : vector<64x64xf32>
    %41 = arith.mulf %40, %40 : vector<64x64xf32>
    %cst_26 = arith.constant dense<0.000000e+00> : vector<64xf32>
    %42 = vector.multi_reduction <add>, %41, %cst_26 [1] : vector<64x64xf32> to vector<64xf32>
    %43 = vector.shape_cast %42 : vector<64xf32> to vector<64x1xf32>
    %44 = math.sqrt %38 : vector<64x1xf32>
    %45 = math.rsqrt %43 : vector<64x1xf32>
    %46 = arith.mulf %44, %45 : vector<64x1xf32>
    %47 = vector.broadcast %46 : vector<64x1xf32> to vector<64x64xf32>
    %48 = arith.mulf %40, %47 : vector<64x64xf32>
    %49 = arith.mulf %35, %35 : vector<64x64xf32>
    %cst_27 = arith.constant dense<0.000000e+00> : vector<64xf32>
    %50 = vector.multi_reduction <add>, %49, %cst_27 [1] : vector<64x64xf32> to vector<64xf32>
    %51 = vector.shape_cast %50 : vector<64xf32> to vector<64x1xf32>
    %52 = arith.mulf %35, %35 : vector<64x64xf32>
    %53 = arith.mulf %52, %35 : vector<64x64xf32>
    %54 = arith.mulf %53, %53 : vector<64x64xf32>
    %cst_28 = arith.constant dense<0.000000e+00> : vector<64xf32>
    %55 = vector.multi_reduction <add>, %54, %cst_28 [1] : vector<64x64xf32> to vector<64xf32>
    %56 = vector.shape_cast %55 : vector<64xf32> to vector<64x1xf32>
    %57 = math.sqrt %51 : vector<64x1xf32>
    %58 = math.rsqrt %56 : vector<64x1xf32>
    %59 = arith.mulf %57, %58 : vector<64x1xf32>
    %60 = vector.broadcast %59 : vector<64x1xf32> to vector<64x64xf32>
    %61 = arith.mulf %53, %60 : vector<64x64xf32>
    %c0_29 = arith.constant 0 : index
    %c0_30 = arith.constant 0 : index
    %62 = vector.load %arg8[%c0_29, %c0_30] : memref<64x64xf32, #tpu.memory_space<vmem>>, vector<64x64xf32>
    %cst_31 = arith.constant dense<0.000000e+00> : vector<64xf32>
    %63 = vector.multi_reduction <add>, %61, %cst_31 [0] : vector<64x64xf32> to vector<64xf32>
    %64 = vector.shape_cast %63 : vector<64xf32> to vector<1x64xf32>
    %65 = vector.broadcast %64 : vector<1x64xf32> to vector<64x64xf32>
    %66 = arith.mulf %48, %65 : vector<64x64xf32>
    %cst_32 = arith.constant dense<0.000000e+00> : vector<64x64xf32>
    %67 = tpu.matmul %66, %62, %cst_32 {dimension_numbers = #tpu.dot_dimension_numbers<[1], [0], [0], [1], [0, 0, 1, 1], [], []>} : vector<64x64xf32>, vector<64x64xf32>, vector<64x64xf32> -> vector<64x64xf32>
    %cst_33 = arith.constant 9.99999997E-7 : f32
    %68 = vector.broadcast %cst_33 : f32 to vector<64x64xf32>
    %69 = arith.addf %67, %68 : vector<64x64xf32>
    %70 = tpu.reciprocal %69 {approx = true} : vector<64x64xf32> -> vector<64x64xf32>
    %cst_34 = arith.constant dense<0.000000e+00> : vector<64x64xf32>
    %71 = tpu.matmul %61, %11, %cst_34 {dimension_numbers = #tpu.dot_dimension_numbers<[0], [0], [1], [1], [0, 1, 1, 1], [], []>} : vector<64x64xf32>, vector<64x64xf32>, vector<64x64xf32> -> vector<64x64xf32>
    %72 = arith.mulf %71, %62 : vector<64x64xf32>
    %cst_35 = arith.constant dense<0.000000e+00> : vector<64x64xf32>
    %73 = tpu.matmul %48, %72, %cst_35 {dimension_numbers = #tpu.dot_dimension_numbers<[1], [0], [0], [1], [0, 0, 1, 1], [], []>} : vector<64x64xf32>, vector<64x64xf32>, vector<64x64xf32> -> vector<64x64xf32>
    %74 = arith.mulf %73, %70 : vector<64x64xf32>
    %c0_36 = arith.constant 0 : index
    %c0_37 = arith.constant 0 : index
    %75 = vector.load %arg9[%c0_36, %c0_37] : memref<64x64xf32, #tpu.memory_space<vmem>>, vector<64x64xf32>
    %cst_38 = arith.constant dense<0.000000e+00> : vector<64x64xf32>
    %76 = tpu.matmul %74, %75, %cst_38 {dimension_numbers = #tpu.dot_dimension_numbers<[1], [0], [0], [1], [0, 0, 1, 1], [], []>} : vector<64x64xf32>, vector<64x64xf32>, vector<64x64xf32> -> vector<64x64xf32>
    %c0_39 = arith.constant 0 : index
    %c0_40 = arith.constant 0 : index
    %77 = vector.load %arg10[%c0_39, %c0_40] : memref<1x64xf32, #tpu.memory_space<vmem>>, vector<1x64xf32>
    %78 = vector.broadcast %77 : vector<1x64xf32> to vector<64x64xf32>
    %79 = arith.addf %76, %78 : vector<64x64xf32>
    %c0_41 = arith.constant 0 : index
    %c0_42 = arith.constant 0 : index
    %c0_43 = arith.constant 0 : index
    %80 = vector.load %arg11[%c0_41, %c0_42, %c0_43] : memref<1x64x64xf32, #tpu.memory_space<vmem>>, vector<1x64x64xf32>
    %81 = vector.shape_cast %80 : vector<1x64x64xf32> to vector<64x64xf32>
    %82 = vector.shape_cast %79 : vector<64x64xf32> to vector<1x64x64xf32>
    tpu.vector_store %arg11[%c0_41, %c0_42, %c0_43], %82 {strides = array<i32>} : memref<1x64x64xf32, #tpu.memory_space<vmem>>, vector<1x64x64xf32>,
    return
  }
  func.func @transform_0(%arg0: i32) -> (i32, i32, i32) {
    %c0_i32 = arith.constant 0 : i32
    %c0_i32_0 = arith.constant 0 : i32
    %c0_i32_1 = arith.constant 0 : i32
    return %arg0, %c0_i32, %c0_i32_0 : i32, i32, i32
  }
  func.func @transform_1(%arg0: i32) -> (i32, i32, i32) {
    %c0_i32 = arith.constant 0 : i32
    %c0_i32_0 = arith.constant 0 : i32
    %c0_i32_1 = arith.constant 0 : i32
    return %arg0, %c0_i32, %c0_i32_0 : i32, i32, i32
  }
  func.func @transform_2(%arg0: i32) -> (i32, i32, i32) {
    %c0_i32 = arith.constant 0 : i32
    %c0_i32_0 = arith.constant 0 : i32
    %c0_i32_1 = arith.constant 0 : i32
    return %arg0, %c0_i32, %c0_i32_0 : i32, i32, i32
  }
  func.func @transform_3(%arg0: i32) -> (i32, i32) {
    %c0_i32 = arith.constant 0 : i32
    %c0_i32_0 = arith.constant 0 : i32
    %c0_i32_1 = arith.constant 0 : i32
    return %c0_i32, %c0_i32_0 : i32, i32
  }
  func.func @transform_4(%arg0: i32) -> (i32, i32) {
    %c0_i32 = arith.constant 0 : i32
    %c0_i32_0 = arith.constant 0 : i32
    %c0_i32_1 = arith.constant 0 : i32
    return %c0_i32, %c0_i32_0 : i32, i32
  }
  func.func @transform_5(%arg0: i32) -> (i32, i32) {
    %c0_i32 = arith.constant 0 : i32
    %c0_i32_0 = arith.constant 0 : i32
    %c0_i32_1 = arith.constant 0 : i32
    return %c0_i32, %c0_i32_0 : i32, i32
  }
  func.func @transform_6(%arg0: i32) -> (i32, i32) {
    %c0_i32 = arith.constant 0 : i32
    %c0_i32_0 = arith.constant 0 : i32
    %c0_i32_1 = arith.constant 0 : i32
    return %c0_i32, %c0_i32_0 : i32, i32
  }
  func.func @transform_7(%arg0: i32) -> (i32, i32) {
    %c0_i32 = arith.constant 0 : i32
    %c0_i32_0 = arith.constant 0 : i32
    %c0_i32_1 = arith.constant 0 : i32
    return %c0_i32, %c0_i32_0 : i32, i32
  }
  func.func @transform_8(%arg0: i32) -> (i32, i32) {
    %c0_i32 = arith.constant 0 : i32
    %c0_i32_0 = arith.constant 0 : i32
    %c0_i32_1 = arith.constant 0 : i32
    return %c0_i32, %c0_i32_0 : i32, i32
  }
  func.func @transform_9(%arg0: i32) -> (i32, i32) {
    %c0_i32 = arith.constant 0 : i32
    %c0_i32_0 = arith.constant 0 : i32
    %c0_i32_1 = arith.constant 0 : i32
    return %c0_i32, %c0_i32_0 : i32, i32
  }
  func.func @transform_10(%arg0: i32) -> (i32, i32, i32) {
    %c0_i32 = arith.constant 0 : i32
    %c0_i32_0 = arith.constant 0 : i32
    %c0_i32_1 = arith.constant 0 : i32
    return %arg0, %c0_i32, %c0_i32_0 : i32, i32, i32
  }
}

</mosaic_0001>

<bundles_post_ra>
// kernel: tpu_custom_call.1
= control target key start
LH: loop header
LB: loop body
LE: loop exit
PB: predicated region body
PF: predicated region fallthrough
CT: control target
= control target key end

     0   :  { %s3727_s0 = inlined_call_operand.hbm [shape: f32[2,64,64], index: 0, kind: input, shape index: {}]   ;;  %s3728_s1 = inlined_call_operand.hbm [shape: f32[2,64,64], index: 1, kind: input, shape index: {}]   ;;  %s3729_s2 = inlined_call_operand.hbm [shape: f32[2,64,64], index: 2, kind: input, shape index: {}]   ;;  %s3730_s3 = inlined_call_operand.hbm [shape: f32[64,64], index: 3, kind: input, shape index: {}]   ;;  %s3731_s4 = inlined_call_operand.hbm [shape: f32[64,64], index: 4, kind: input, shape index: {}]   ;;  %s3732_s5 = inlined_call_operand.hbm [shape: f32[64,64], index: 5, kind: input, shape index: {}]   ;;  %s3733_s6 = inlined_call_operand.vmem [shape: f32[1,64], index: 6, kind: input, shape index: {}]   ;;  %s3734_s7 = inlined_call_operand.hbm [shape: f32[64,64], index: 7, kind: input, shape index: {}]   ;;  %s3735_s8 = inlined_call_operand.hbm [shape: f32[64,64], index: 8, kind: input, shape index: {}]   ;;  %s3736_s9 = inlined_call_operand.vmem [shape: f32[1,64], index: 9, kind: input, shape index: {}]   ;;  %s3737_s10 = inlined_call_operand.hbm [shape: f32[2,64,64], index: 10, kind: output, shape index: {}]  }
   0x1   :  { %3750 = sst [smem:[#allocation28_spill]] %s3728_s1 }
   0x2   :  { %3751 = sst [smem:[#allocation29_spill]] %s3730_s3 }
   0x3   :  { %3752 = sst [smem:[#allocation30_spill]] %s3731_s4 }
   0x4   :  { %3753 = sst [smem:[#allocation31_spill]] %s3732_s5 }
   0x5   :  { %3754 = sst [smem:[#allocation32_spill]] %s3737_s10 }
   0x6   :  { %15 = vsyncpa [#allocation3], 0 }
   0x7   :  { %17 = vsyncpa [#allocation3 + $0x1], 0 }
   0x8   :  { %18 = vsyncpa [#allocation6], 0 }
   0x9   :  { %20 = vsyncpa [#allocation6 + $0x1], 0 }
   0xa   :  { %21 = vsyncpa [#allocation9], 0 }
   0xb   :  { %22 = vsyncpa [#allocation12], 0 }
   0xc   :  { %23 = vsyncpa [#allocation15], 0 }
   0xd   :  { %24 = vsyncpa [#allocation4], 0 }
   0xe   :  { %26 = vsyncpa [#allocation4 + $0x1], 0  ;;  %s2634_s13 = smov 0   ;;  %s2636_s14 = smov 0  }
   0xf   :  { %s2638_s15 = smov 0   ;;  %s2640_s16 = smov 0  }
  0x10 LB: > { %3755 = sst [smem:[#allocation23_spill]] %s2556_s13  ;;  %s2658_s20 = sadd.s32 4294967295, %s2568_s16   ;;  %s2568_s16 = sphi %s2640_s16, %s3808_s16   ;;  %s2564_s15 = sphi %s2638_s15, %s3812_s15   ;;  %s2560_s14 = sphi %s2636_s14, %s3811_s14   ;;  %s2556_s13 = sphi %s2634_s13, %s3810_s13  }
  0x11   : > { %3756 = sst [smem:[#allocation24_spill]] %s2568_s16  ;;  %p1932_p0 = scmp.ge.s32.totalorder %s2568_s16, 1 }
  0x12   : > { %s3757_s3 = sld [smem:[#allocation29_spill]]  ;;  %p3747_p1 = scmp.eq.s32.totalorder %s2658_s20, 0 }
  0x13   : > { %p275_p2 = scmp.eq.s32.totalorder %s2658_s20, 1  ;;  %p288_p3 = scmp.lt.s32.totalorder %s2568_s16, 3 }
  0x14   : > { %s2570_s22 = smov [#allocation8]   ;;  %s3759_s5 = sld [smem:[#allocation31_spill]] }
  0x15   : > { %p2664_p4 = pnand %p1932_p0, %p288_p3  ;;  %s301_s23 = sshll.u32 %s2570_s22, 4  ;;  %s302_s23 = int_to_ptr.vmem [resolvable:$true] %s301_s23 }
  0x16   : > { %s2571_s28 = smov [#allocation11]   ;;  %s3738_s30 = smov 128  }
  0x17   : > { %p2075_p5 = pneg %p2664_p4  ;;  %s329_s29 = sshll.u32 %s2571_s28, 4  ;;  %s330_s29 = int_to_ptr.vmem [resolvable:$true] %s329_s29 }
  0x18   : > { %s299_s19 = sshll.u32 %s3757_s3, 4  ;;  %s3740_s11 = smov 8   ;;  %s300_s19 = int_to_ptr.hbm [resolvable:$true] %s299_s19 }
  0x19   : > { %p2676_p7 = pnand %p2075_p5, %p3747_p1  ;;  %s1931_s12 = sadd.s32 4294967294, %s2568_s16  }
  0x1a   : > { %s327_s26 = sshll.u32 %s3759_s5, 4  ;;  %s2692_s17 = sadd.s32 1, %s2568_s16   ;;  %s328_s26 = int_to_ptr.hbm [resolvable:$true] %s327_s26 }
  0x1b   : > { %2078 = dma.hbm_to_vmem [thread:$0]  (!%p2676_p7), %s300_s19, 1024, %s302_s23, [#allocation9], %s3738_s30, %s3738_s30, %s3740_s11  }
  0x1c   : > { %2084 = dma.hbm_to_vmem [thread:$0]  (!%p2676_p7), %s328_s26, 1024, %s330_s29, [#allocation12], %s3738_s30, %s3738_s30, %s3740_s11  }
  0x1d   : > { %3761 = sst [smem:[#allocation25_spill]] %s2692_s17  ;;  %s39_s18 = sadd.s32 1, %s2564_s15 }
  0x1e   : > { %s36_s22 = ssub.s32 %s2568_s16, %s2692_s17  ;;  %p46_p8 = scmp.ne.s32.totalorder %s2564_s15, %s2560_s14 }
  0x1f   : > { %p37_p9 = scmp.eq.s32.totalorder %s36_s22, 0  ;;  %p47_p10 = scmp.eq.s32.totalorder %s2568_s16, 0 }
  0x20   : > { %p52_p11 = scmp.ne.s32.totalorder %s2560_s14, %s2556_s13  ;;  %p2704_p12 = por %p275_p2, %p46_p8 }
  0x21   : > { %s2709_s23 = scalar_select %p37_p9, %s2564_s15, %s39_s18  }
  0x22   : > { %p48_p13 = por %p47_p10, %p46_p8  ;;  %p2713_p0 = por %p3747_p1, %p52_p11 }
  0x23   : > { %3763 = sst [smem:[#allocation26_spill]] %s2709_s23  ;;  %p281_p3 = scmp.eq.s32.totalorder %s1931_s12, 1 }
  0x24   : > { %p2110_p5 = scmp.lt.s32.totalorder %s2568_s16, 2  ;;  %s3744_s25 = sand.u32 1, %s2564_s15  }
  0x25   : > { %s2720_s26 = sshll.u32 %s2568_s16, 6  ;;  %p2722_p6 = por %p281_p3, %p52_p11 }
  0x26   : > { %s2728_s29 = sshll.u32 %s3744_s25, 6  ;;  %p2730_p2 = pnand %p2110_p5, %p48_p13 }
  0x27   : > { %s3765_s28 = scalar_select %p2722_p6, 1, 0 }
  0x28   : > { %s399_s12 = sand.u32 1, %s2568_s16   ;;  %s3768_s1 = sld [smem:[#allocation28_spill]] }
  0x29   : > { %3766 = sst [smem:[#allocation27_spill]] %s3765_s28  ;;  %s403_s5 = scalar_lea.vmem [#allocation5], %s2728_s29 }
  0x2a   : > { %s411_s23 = sshll.u32 %s403_s5, 4  ;;  %s2740_s17 = scalar_lea.sflag [#allocation6], %s399_s12  ;;  %s412_s23 = int_to_ptr.vmem [resolvable:$true] %s411_s23 }
  0x2b   : > { %p2310_p9 = pneg %p2730_p2 }
  0x2e   : > { %s408_s11 = scalar_lea.hbm %s3768_s1, %s2720_s26 }
  0x2f   : > { %s409_s3 = sshll.u32 %s408_s11, 4  ;;  %s2313_s11 = scalar_lea.hbm %s3768_s1, 128  ;;  %s410_s3 = int_to_ptr.hbm [resolvable:$true] %s409_s3 }
  0x30   : > { %s2306_s25 = sshra.s32 %s410_s3, 4  ;;  %s2307_s25 = int_to_ptr.hbm [resolvable:$true] %s2306_s25 }
  0x31   : > { %s2308_s28 = scalar_lea.hbm %s2307_s25, 64  ;;  %p2314_p13 = scmp.lt.s32.totalorder %s2307_s25, %s3768_s1 }
  0x32   : > { %p2309_p8 = scmp.ne.s32.totalorder %s2307_s25, %s2308_s28  ;;  %p2315_p3 = scmp.lt.s32.totalorder %s2313_s11, %s2308_s28 }
  0x34   : > { %p2311_p10 = pnand %p2310_p9, %p2309_p8  ;;  %p2316_p5 = por %p2315_p3, %p2314_p13 }
  0x36   : > { %p2312_p11 = pneg %p2311_p10 }
  0x38   : > { %p2317_p1 = pnand %p2316_p5, %p2312_p11 }
  0x3a   : > { %2320 = shalt.err (!%p2317_p1)
}
  0x3b   : > { %s3769_s12 = smov 8   ;;  %s3770_s13 = smov 128  }
  0x3c   : > { %2097 = dma.hbm_to_vmem [thread:$0]  (!%p2730_p2), %s410_s3, 1024, %s412_s23, %s2740_s17, %s3770_s13, %s3770_s13, %s3769_s12  }
  0x3d   : > { %s3771_s4 = sld [smem:[#allocation30_spill]]  ;;  %s2574_s25 = smov [#allocation10]  }
  0x3e   : > { %s315_s28 = sshll.u32 %s2574_s25, 4  ;;  %s344_s5 = sshll.u32 %s3734_s7, 4  ;;  %s316_s28 = int_to_ptr.vmem [resolvable:$true] %s315_s28  ;;  %s345_s5 = int_to_ptr.hbm [resolvable:$true] %s344_s5 }
  0x3f   : > { %s2575_s3 = smov [#allocation13]   ;;  %s358_s1 = sshll.u32 %s3735_s8, 4  ;;  %s359_s1 = int_to_ptr.hbm [resolvable:$true] %s358_s1 }
  0x40   : > { %s346_s10 = sshll.u32 %s2575_s3, 4  ;;  %s2576_s25 = smov [#allocation14]   ;;  %s347_s10 = int_to_ptr.vmem [resolvable:$true] %s346_s10 }
  0x41   : > { %2087 = dma.hbm_to_vmem [thread:$0]  (!%p2676_p7), %s345_s5, 1024, %s347_s10, [#allocation12], %s3770_s13, %s3770_s13, %s3769_s12  }
  0x42   : > { %s360_s11 = sshll.u32 %s2576_s25, 4  ;;  %s386_s22 = scalar_lea.hbm %s3727_s0, %s2720_s26  ;;  %s361_s11 = int_to_ptr.vmem [resolvable:$true] %s360_s11 }
  0x43   : > { %s313_s30 = sshll.u32 %s3771_s4, 4  ;;  %s387_s3 = sshll.u32 %s386_s22, 4  ;;  %s314_s30 = int_to_ptr.hbm [resolvable:$true] %s313_s30  ;;  %s388_s3 = int_to_ptr.hbm [resolvable:$true] %s387_s3 }
  0x44   : > { %2081 = dma.hbm_to_vmem [thread:$0]  (!%p2676_p7), %s314_s30, 1024, %s316_s28, [#allocation9], %s3770_s13, %s3770_s13, %s3769_s12  }
  0x45   : > { %2090 = dma.hbm_to_vmem [thread:$0]  (!%p2676_p7), %s359_s1, 1024, %s361_s11, [#allocation15], %s3770_s13, %s3770_s13, %s3769_s12  }
  0x46   : > { %s381_s23 = scalar_lea.vmem [#allocation2], %s2728_s29  ;;  %s3772_s4 = sand.u32 1, %s2564_s15  }
  0x47   : > { %s389_s16 = sshll.u32 %s381_s23, 4  ;;  %s378_s5 = scalar_lea.sflag [#allocation3], %s3772_s4  ;;  %s390_s16 = int_to_ptr.vmem [resolvable:$true] %s389_s16 }
  0x48   : > { %s2426_s10 = sshra.s32 %s388_s3, 4  ;;  %s2433_s28 = scalar_lea.hbm %s3727_s0, 128  ;;  %s2427_s10 = int_to_ptr.hbm [resolvable:$true] %s2426_s10 }
  0x49   : > { %s2428_s25 = scalar_lea.hbm %s2427_s10, 64  ;;  %p2434_p7 = scmp.lt.s32.totalorder %s2427_s10, %s3727_s0 }
  0x4a   : > { %p2429_p1 = scmp.ne.s32.totalorder %s2427_s10, %s2428_s25  ;;  %p2435_p11 = scmp.lt.s32.totalorder %s2433_s28, %s2428_s25 }
  0x4c   : > { %p2431_p8 = pnand %p2429_p1, %p2310_p9  ;;  %p2436_p13 = por %p2435_p11, %p2434_p7 }
  0x4e   : > { %p2432_p10 = pneg %p2431_p8 }
  0x50   : > { %p2437_p3 = pnand %p2436_p13, %p2432_p10 }
  0x52   : > { %2440 = shalt.err (!%p2437_p3)
}
  0x53   : > { %2094 = dma.hbm_to_vmem [thread:$0]  (!%p2730_p2), %s388_s3, 1024, %s390_s16, %s378_s5, %s3770_s13, %s3770_s13, %s3769_s12  }
  0x54   : > { %s430_s23 = scalar_lea.hbm %s3729_s2, %s2720_s26  ;;  %s425_s30 = scalar_lea.vmem [#allocation7], %s2728_s29 }
  0x55   : > { %s431_s27 = sshll.u32 %s430_s23, 4  ;;  %s433_s10 = sshll.u32 %s425_s30, 4  ;;  %s432_s27 = int_to_ptr.hbm [resolvable:$true] %s431_s27  ;;  %s434_s10 = int_to_ptr.vmem [resolvable:$true] %s433_s10 }
  0x56   : > { %s2456_s25 = sshra.s32 %s432_s27, 4  ;;  %s2463_s3 = scalar_lea.hbm %s3729_s2, 128  ;;  %s2457_s25 = int_to_ptr.hbm [resolvable:$true] %s2456_s25 }
  0x57   : > { %s2458_s28 = scalar_lea.hbm %s2457_s25, 64  ;;  %p2464_p10 = scmp.lt.s32.totalorder %s2457_s25, %s3729_s2 }
  0x58   : > { %p2459_p5 = scmp.ne.s32.totalorder %s2457_s25, %s2458_s28  ;;  %p2465_p7 = scmp.lt.s32.totalorder %s2463_s3, %s2458_s28 }
  0x5a   : > { %p2461_p1 = pnand %p2459_p5, %p2310_p9  ;;  %p2466_p11 = por %p2465_p7, %p2464_p10 }
  0x5c   : > { %p2462_p8 = pneg %p2461_p1 }
  0x5e   : > { %p2467_p13 = pnand %p2466_p11, %p2462_p8 }
  0x60   : > { %2470 = shalt.err (!%p2467_p13)
}
  0x61   : > { %2100 = dma.hbm_to_vmem [thread:$0]  (!%p2730_p2), %s432_s27, 1024, %s434_s10, %s2740_s17, %s3770_s13, %s3770_s13, %s3769_s12  }
  0x62   : > { %445 = sbr.rel (%p2664_p4) target bundleno = 1117 (0x45d), region = 60  ;;  %s2827_s26 = sand.u32 (!%p2664_p4), 1, %s2560_s14  }
  0x63   : > { %s2830_s29 = sshll.u32 (!%p2664_p4), %s2827_s26, 6  ;;  %s448_s4 = scalar_lea.sflag (!%p2664_p4), [#allocation3], %s2827_s26 }
  0x64   : > { %s2834_s22 = scalar_lea.vmem (!%p2664_p4), [#allocation2], %s2830_s29 }
  0x67   : > { %2531 = dma.done.wait (%p2713_p0), %s448_s4, 1024  }
  0x68   : > { %2533 = vsyncadd (%p2713_p0), %s448_s4, 4294966272  ;;  %s457_s13 = sand.u32 1, %s2658_s20   ;;  %s2842_s17 = scalar_lea.vmem [#allocation5], %s2830_s29 }
  0x69   : > { %s458_s21 = scalar_lea.sflag [#allocation6], %s457_s13 }
  0x6a   : > { %2535 = dma.done.wait (%p2713_p0), %s458_s21, 2048  }
  0x6b   : > { %2537 = vsyncadd (%p2713_p0), %s458_s21, 4294965248  ;;  %s2849_s18 = scalar_lea.vmem [#allocation7], %s2830_s29  ;;  %p3773_p4 = scmp.eq.s32.totalorder %s2658_s20, 0 }
  0x6d   : > { %2539 = dma.done.wait (%p3773_p4), [#allocation9], 2048   ;;  %p3774_p2 = pmov %p3773_p4 }
  0x6f   : > { %2541 = vsyncadd (%p3774_p2), [#allocation9], 4294965248  ;;  %p3775_p9 = pmov %p3774_p2 }
  0x70   : > { %p3776_p3 = pmov %p3774_p2 }
  0x71   : > { %2543 = dma.done.wait (%p3775_p9), [#allocation12], 2048  }
  0x72   : > { %2545 = vsyncadd (%p3776_p3), [#allocation12], 4294965248  ;;  %p3777_p5 = pmov %p3774_p2 }
  0x73   : > { %p3778_p0 = pmov %p3774_p2 }
  0x74   : > { %2547 = dma.done.wait (%p3777_p5), [#allocation15], 1024  }
  0x75   : > { %2549 = vsyncadd (%p3778_p0), [#allocation15], 4294966272  ;;  %v559_v0 = vld [vmem:[#allocation8 + $0x38] sm:$0xff]  ;;  %v558_v2 = vld [vmem:[#allocation8 + $0x30] sm:$0xff]  ;;  %vm560_vm0 = vcmask 523264   ;;  %s543_s30 = scalar_lea.vmem [#allocation16], %s2830_s29 }
  0x76   : > { %v641_v1 = vld [vmem:[#allocation10 + $0x38] sm:$0xff]  ;;  %593 = vmatpush.msra.mxu0 %v559_v0  ;;  %v640_v3 = vld [vmem:[#allocation10 + $0x30] sm:$0xff]  ;;  %v557_v4 = vld [vmem:[#allocation8 + $0x28] sm:$0xff]  ;;  %2023 = vmatpush.msra.mxu3 %v559_v0  ;;  %s2022_s10 = sshll.u32 %s2658_s20, 6  ;;  %s3803_s1 = sld [smem:[#allocation32_spill]] }
  0x77   : > { %2031 = vmatpush.msra.mxu1 %v641_v1  ;;  %v639_v5 = vld [vmem:[#allocation10 + $0x28] sm:$0xff]  ;;  %v556_v6 = vld [vmem:[#allocation8 + $0x20] sm:$0xff]  ;;  %v555_v8 = vld [vmem:[#allocation8 + $0x18] sm:$0xff]  ;;  %s1764_s3 = sshll.u32 %s543_s30, 4  ;;  %s1752_s5 = scalar_lea.sflag [#allocation4], %s2827_s26  ;;  %s1765_s3 = int_to_ptr.vmem [resolvable:$true] %s1764_s3 }
  0x78   : > { %594 = vmatpush.msra.mxu0 %v558_v2  ;;  %v638_v7 = vld [vmem:[#allocation10 + $0x20] sm:$0xff]  ;;  %2024 = vmatpush.msra.mxu3 %v558_v2  ;;  %v637_v9 = vld [vmem:[#allocation10 + $0x18] sm:$0xff]  ;;  %v554_v10 = vld [vmem:[#allocation8 + $0x10] sm:$0xff] }
  0x79   : > { %2032 = vmatpush.msra.mxu1 %v640_v3  ;;  %v636_v11 = vld [vmem:[#allocation10 + $0x10] sm:$0xff]  ;;  %v553_v12 = vld [vmem:[#allocation8 + $0x8] sm:$0xff]  ;;  %v552_v14 = vld [vmem:[#allocation8] sm:$0xff] }
  0x7a   : > { %595 = vmatpush.msra.mxu0 %v557_v4  ;;  %2025 = vmatpush.msra.mxu3 %v557_v4  ;;  %v635_v13 = vld [vmem:[#allocation10 + $0x8] sm:$0xff]  ;;  %v634_v15 = vld [vmem:[#allocation10] sm:$0xff]  ;;  %v628_v17 = vld [vmem:[%s2842_s17 + $0x10] sm:$0xff] }
  0x7b   : > { %2033 = vmatpush.msra.mxu1 %v639_v5  ;;  %v544_v16 = vld [vmem:[%s2834_s22] sm:$0xff]  ;;  %v545_v18 = vld [vmem:[%s2834_s22 + $0x8] sm:$0xff]  ;;  %v629_v19 = vld [vmem:[%s2842_s17 + $0x18] sm:$0xff] }
  0x7c   : > { %596 = vmatpush.msra.mxu0 %v556_v6  ;;  %2026 = vmatpush.msra.mxu3 %v556_v6  ;;  %v546_v20 = vld [vmem:[%s2834_s22 + $0x10] sm:$0xff]  ;;  %v626_v21 = vld [vmem:[%s2842_s17] sm:$0xff]  ;;  %v547_v23 = vld [vmem:[%s2834_s22 + $0x18] sm:$0xff]  ;;  %s1763_s11 = scalar_lea.hbm %s3803_s1, %s2022_s10  ;;  %s2506_s13 = scalar_lea.hbm %s3803_s1, 128 }
  0x7d   : > { %2034 = vmatpush.msra.mxu1 %v638_v7  ;;  %v630_v22 = vld [vmem:[%s2842_s17 + $0x20] sm:$0xff]  ;;  %v627_v24 = vld [vmem:[%s2842_s17 + $0x8] sm:$0xff]  ;;  %v632_v27 = vld [vmem:[%s2842_s17 + $0x30] sm:$0xff]  ;;  %s1766_s16 = sshll.u32 %s1763_s11, 4  ;;  %s1767_s16 = int_to_ptr.hbm [resolvable:$true] %s1766_s16 }
  0x7e   : > { %597 = vmatpush.msra.mxu0 %v555_v8  ;;  %2027 = vmatpush.msra.mxu3 %v555_v8  ;;  %v631_v25 = vld [vmem:[%s2842_s17 + $0x28] sm:$0xff]  ;;  %v548_v26 = vld [vmem:[%s2834_s22 + $0x20] sm:$0xff]  ;;  %v633_v29 = vld [vmem:[%s2842_s17 + $0x38] sm:$0xff]  ;;  %s2500_s29 = sshra.s32 %s1767_s16, 4  ;;  %s2501_s29 = int_to_ptr.hbm [resolvable:$true] %s2500_s29 }
  0x7f   : > { %2035 = vmatpush.msra.mxu1 %v637_v9  ;;  %v549_v28 = vld [vmem:[%s2834_s22 + $0x28] sm:$0xff]  ;;  %v550_v30 = vld [vmem:[%s2834_s22 + $0x30] sm:$0xff]  ;;  %v551_v31 = vld [vmem:[%s2834_s22 + $0x38] sm:$0xff]  ;;  %s2502_s20 = scalar_lea.hbm %s2501_s29, 64  ;;  %p2507_p7 = scmp.lt.s32.totalorder %s2501_s29, %s3803_s1 }
  0x80   : > { %598 = vmatpush.msra.mxu0 %v554_v10  ;;  %2028 = vmatpush.msra.mxu3 %v554_v10  ;;  %v788_v32 = vld [vmem:[%s3733_s6] sm:$0x1]  ;;  %p2503_p1 = scmp.ne.s32.totalorder %s2501_s29, %s2502_s20  ;;  %p2508_p11 = scmp.lt.s32.totalorder %s2506_s13, %s2502_s20 }
  0x81   : > { %2036 = vmatpush.msra.mxu1 %v636_v11  ;;  %v790_v33 = vand.u32 2147483647, %v788_v32  ;;  %v789_v39 = vmax.f32 %v788_v32, 0.0 }
  0x82   : > { %599 = vmatpush.msra.mxu0 %v553_v12  ;;  %2029 = vmatpush.msra.mxu3 %v553_v12  ;;  %p2504_p8 = pnand %p2503_p1, %p2704_p12  ;;  %p2509_p13 = por %p2508_p11, %p2507_p7 }
  0x83   : > { %2037 = vmatpush.msra.mxu1 %v635_v13  ;;  %v791_v34 = vsub.f32 0.0, %v790_v33 }
  0x84   : > { %600 = vmatpush.msra.mxu0 %v552_v14  ;;  %2030 = vmatpush.msra.mxu3 %v552_v14  ;;  %p2505_p10 = pneg %p2504_p8 }
  0x85   : > { %2038 = vmatpush.msra.mxu1 %v634_v15  ;;  %1958 = vmatmul.msk.f32.vlgmr.msra.gmra.mxu0 %vm560_vm0, %v544_v16  ;;  %v792_v35 = vmul.f32 1.442695, %v791_v34 }
  0x86   : > { %1968 = vmatmul.msk.f32.vlgmr.msra.gmra.mxu1 %vm560_vm0, %v628_v17  ;;  %674 = vmatpush.msrb.mxu0 %v641_v1  ;;  %p2510_p4 = pnand %p2509_p13, %p2505_p10 }
  0x87   : > { %1960 = vmatmul.msk.f32.vlgmr.msra.gmra.mxu3 %vm560_vm0, %v546_v20  ;;  %2160 = vpow2.f32 %v792_v35 }
  0x88   : > { %675 = vmatpush.msrb.mxu0 %v640_v3 }
  0x8a   : > { %676 = vmatpush.msrb.mxu0 %v639_v5 }
  0x8c   : > { %677 = vmatpush.msrb.mxu0 %v638_v7 }
  0x8d   : > { %1959 = vmatmul.msk.f32.gmra.mxu0 %vm560_vm0, %v545_v18  ;;  %v2161_v36 = vpop.eup %2160 }
  0x8e   : > { %1969 = vmatmul.msk.f32.gmra.mxu1 %vm560_vm0, %v629_v19  ;;  %678 = vmatpush.msrb.mxu0 %v637_v9  ;;  %v794_v37 = vadd.f32 1.0, %v2161_v36 }
  0x8f   : > { %1961 = vmatmul.msk.f32.gmra.mxu3 %vm560_vm0, %v547_v23 }
  0x90   : > { %679 = vmatpush.msrb.mxu0 %v636_v11  ;;  %2162 = vlog2.f32 %v794_v37 }
  0x92   : > { %680 = vmatpush.msrb.mxu0 %v635_v13 }
  0x94   : > { %681 = vmatpush.msrb.mxu0 %v634_v15 }
  0x95   : > { %1966 = vmatmul.msk.f32.vlgmr.msrb.gmra.mxu0 %vm560_vm0, %v626_v21 }
  0x96   : > { %1970 = vmatmul.msk.f32.gmra.mxu1 %vm560_vm0, %v630_v22  ;;  %v2163_v38 = vpop.eup %2162 }
  0x97   : > { %1962 = vmatmul.msk.f32.gmra.mxu3 %vm560_vm0, %v548_v26  ;;  %v796_v40 = vmul.f32 0.6931472, %v2163_v38 }
  0x99   : > { %v797_v41 = vadd.f32 %v796_v40, %v789_v39 }
  0x9b   : > { %2164 = vrcp.f32 %v797_v41 }
  0x9d   : > { %1967 = vmatmul.msk.f32.gmra.mxu0 %vm560_vm0, %v627_v24 }
  0x9e   : > { %1971 = vmatmul.msk.f32.gmra.mxu1 %vm560_vm0, %v631_v25 }
  0x9f   : > { %1963 = vmatmul.msk.f32.gmra.mxu3 %vm560_vm0, %v549_v28 }
  0xa1   : > { %v2165_v42 = vpop.eup %2164 }
  0xa2   : > { %v2900_v45 = vperm.slane %v2165_v42, 0 }
  0xa6   : > { %1972 = vmatmul.msk.f32.gmra.mxu1 %vm560_vm0, %v632_v27 }
  0xa7   : > { %1964 = vmatmul.msk.f32.gmra.mxu3 %vm560_vm0, %v550_v30 }
  0xae   : > { %1973 = vmatmul.msk.f32.gmra.mxu1 %vm560_vm0, %v633_v29 }
  0xaf   : > { %1965 = vmatmul.msk.f32.gmra.mxu3 %vm560_vm0, %v551_v31 }
 0x102   : > { %v2898_v43 = vpop.f32.mrf.mxu0 }
 0x103   : > { %v689_v44 = vpop.f32.mrf.mxu1  ;;  %v799_v41 = vmax.f32 %v2898_v43, 0.0 }
 0x104   : > { %v828_v46 = vmax.f32 %v689_v44, 0.0 }
 0x106   : > { %v836_v47 = vadd.f32 1e-06, %v828_v46 }
 0x108   : > { %v844_v48 = vmul.f32 %v836_v47, %v2900_v45 }
 0x10a   : > { %v1116_v49 = vmul.f32 %v844_v48, %v844_v48  ;;  %v2903_v50 = vpop.f32.mrf.mxu0  ;;  %v608_v47 = vpop.f32.mrf.mxu3 }
 0x10b   : > { %v692_v51 = vpop.f32.mrf.mxu1 }
 0x10c   : > { %v829_v52 = vmax.f32 %v692_v51, 0.0  ;;  %v1128_v53 = vsel %vm560_vm0, %v1116_v49, 0.0  ;;  %v2906_v54 = vmul.f32 %v1116_v49, %v844_v48  ;;  %v807_v51 = vadd.f32 1e-06, %v799_v41 }
 0x10d   : > { %1129 = vadd.xlane.f32.xlu1 %v1128_v53 }
 0x10e   : > { %v837_v55 = vadd.f32 1e-06, %v829_v52  ;;  %v1156_v56 = vmul.f32 %v2906_v54, %v2906_v54 }
 0x110   : > { %v845_v57 = vmul.f32 %v837_v55, %v2900_v45  ;;  %v1168_v58 = vsel %vm560_vm0, %v1156_v56, 0.0 }
 0x111   : > { %1169 = vadd.xlane.f32.xlu0 %v1168_v58  ;;  %v800_v58 = vmax.f32 %v2903_v50, 0.0 }
 0x112   : > { %v1117_v59 = vmul.f32 %v845_v57, %v845_v57  ;;  %v683_v60 = vpop.f32.mrf.mxu0 }
 0x113   : > { %v695_v61 = vpop.f32.mrf.mxu1  ;;  %v826_v62 = vmax.f32 %v683_v60, 0.0  ;;  %v722_v60 = vld [vmem:[#allocation11 + $0x38] sm:$0xff] }
 0x114   : > { %v830_v63 = vmax.f32 %v695_v61, 0.0  ;;  %v1131_v0 = vsel %vm560_vm0, %v1117_v59, 0.0  ;;  %v2913_v1 = vmul.f32 %v1117_v59, %v845_v57  ;;  %v818_v57 = vmul.f32 %v2900_v45, %v807_v51  ;;  %v721_v61 = vld [vmem:[#allocation11 + $0x30] sm:$0xff]  ;;  %2039 = vmatpush.msra.mxu2 %v722_v60  ;;  %755 = vmatpush.msra.mxu0 %v722_v60  ;;  %v712_v60 = vld [vmem:[%s2849_s18 + $0x28] sm:$0xff] }
 0x115   : > { %1132 = vadd.xlane.f32.xlu2 %v1131_v0  ;;  %v834_v2 = vadd.f32 1e-06, %v826_v62  ;;  %v808_v0 = vadd.f32 1e-06, %v800_v58 }
 0x116   : > { %v838_v3 = vadd.f32 1e-06, %v830_v63  ;;  %v1157_v4 = vmul.f32 %v2913_v1, %v2913_v1  ;;  %v611_v63 = vpop.f32.mrf.mxu3  ;;  %2040 = vmatpush.msra.mxu2 %v721_v61  ;;  %756 = vmatpush.msra.mxu0 %v721_v61 }
 0x117   : > { %v842_v5 = vmul.f32 %v834_v2, %v2900_v45  ;;  %v850_v2 = vmul.f32 %v818_v57, %v818_v57 }
 0x118   : > { %v846_v6 = vmul.f32 %v838_v3, %v2900_v45  ;;  %v1171_v10 = vsel %vm560_vm0, %v1157_v4, 0.0  ;;  %v720_v3 = vld [vmem:[#allocation11 + $0x28] sm:$0xff]  ;;  %v801_v4 = vmax.f32 %v608_v47, 0.0 }
 0x119   : > { %v1114_v8 = vmul.f32 %v842_v5, %v842_v5  ;;  %2041 = vmatpush.msra.mxu2 %v720_v3  ;;  %757 = vmatpush.msra.mxu0 %v720_v3 }
 0x11a   : > { %v1118_v7 = vmul.f32 %v846_v6, %v846_v6  ;;  %v686_v9 = vpop.f32.mrf.mxu0 }
 0x11b   : > { %v698_v11 = vpop.f32.mrf.mxu1  ;;  %v827_v12 = vmax.f32 %v686_v9, 0.0  ;;  %v1122_v14 = vsel %vm560_vm0, %v1114_v8, 0.0  ;;  %v2922_v16 = vmul.f32 %v1114_v8, %v842_v5  ;;  %v819_v5 = vmul.f32 %v2900_v45, %v808_v0  ;;  %v718_v8 = vld [vmem:[#allocation11 + $0x18] sm:$0xff] }
 0x11c   : > { %v1134_v13 = vsel %vm560_vm0, %v1118_v7, 0.0  ;;  %v831_v15 = vmax.f32 %v698_v11, 0.0  ;;  %1123 = vadd.xlane.f32.xlu0 %v1122_v14  ;;  %v2928_v24 = vmul.f32 %v1118_v7, %v846_v6  ;;  %v2964_v6 = vmul.f32 %v850_v2, %v818_v57  ;;  %v719_v7 = vld [vmem:[#allocation11 + $0x20] sm:$0xff]  ;;  %v717_v11 = vld [vmem:[#allocation11 + $0x10] sm:$0xff] }
 0x11d   : > { %1172 = vadd.xlane.f32.xlu2 %v1171_v10  ;;  %1135 = vadd.xlane.f32.xlu1 %v1134_v13  ;;  %v835_v17 = vadd.f32 1e-06, %v827_v12  ;;  %v1154_v20 = vmul.f32 %v2922_v16, %v2922_v16  ;;  %v809_v9 = vadd.f32 1e-06, %v801_v4  ;;  %v858_v10 = vsel %vm560_vm0, %v850_v2, 0.0 }
 0x11e   : > { %v839_v18 = vadd.f32 1e-06, %v831_v15  ;;  %v1158_v34 = vmul.f32 %v2928_v24, %v2928_v24  ;;  %2042 = vmatpush.msra.mxu2 %v719_v7  ;;  %758 = vmatpush.msra.mxu0 %v719_v7  ;;  %v890_v12 = vmul.f32 %v2964_v6, %v2964_v6  ;;  %v851_v13 = vmul.f32 %v819_v5, %v819_v5  ;;  %v614_v14 = vpop.f32.mrf.mxu3  ;;  %v716_v15 = vld [vmem:[#allocation11 + $0x8] sm:$0xff] }
 0x11f   : > { %v843_v19 = vmul.f32 %v835_v17, %v2900_v45  ;;  %v1162_v25 = vsel %vm560_vm0, %v1154_v20, 0.0  ;;  %v820_v17 = vmul.f32 %v2900_v45, %v809_v9 }
 0x120   : > { %v847_v22 = vmul.f32 %v839_v18, %v2900_v45  ;;  %v1174_v39 = vsel %vm560_vm0, %v1158_v34, 0.0  ;;  %2043 = vmatpush.msra.mxu2 %v718_v8  ;;  %759 = vmatpush.msra.mxu0 %v718_v8  ;;  %v802_v18 = vmax.f32 %v611_v63, 0.0  ;;  %v2971_v20 = vmul.f32 %v851_v13, %v819_v5 }
 0x121   : > { %v1115_v21 = vmul.f32 %v843_v19, %v843_v19 }
 0x122   : > { %v1119_v31 = vmul.f32 %v847_v22, %v847_v22  ;;  %2044 = vmatpush.msra.mxu2 %v717_v11  ;;  %760 = vmatpush.msra.mxu0 %v717_v11 }
 0x123   : > { %v701_v23 = vpop.f32.mrf.mxu1  ;;  %v1125_v26 = vsel %vm560_vm0, %v1115_v21, 0.0  ;;  %v2932_v28 = vmul.f32 %v1115_v21, %v843_v19  ;;  %v898_v19 = vsel %vm560_vm0, %v890_v12, 0.0  ;;  %v715_v21 = vld [vmem:[#allocation11] sm:$0xff] }
 0x124   : > { %v832_v27 = vmax.f32 %v701_v23, 0.0  ;;  %1126 = vadd.xlane.f32.xlu0 %v1125_v26  ;;  %v1137_v36 = vsel %vm560_vm0, %v1119_v31, 0.0  ;;  %v2941_v38 = vmul.f32 %v1119_v31, %v847_v22  ;;  %2045 = vmatpush.msra.mxu2 %v716_v15  ;;  %v709_v22 = vld [vmem:[%s2849_s18 + $0x10] sm:$0xff]  ;;  %v810_v23 = vadd.f32 1e-06, %v802_v18  ;;  %v714_v18 = vld [vmem:[%s2849_s18 + $0x38] sm:$0xff] }
 0x125   : > { %1163 = vadd.xlane.f32.xlu1 %v1162_v25  ;;  %v1155_v30 = vmul.f32 %v2932_v28, %v2932_v28  ;;  %761 = vmatpush.msra.mxu0 %v716_v15  ;;  %v852_v25 = vmul.f32 %v820_v17, %v820_v17  ;;  %v861_v26 = vsel %vm560_vm0, %v851_v13, 0.0  ;;  %v803_v31 = vmax.f32 %v614_v14, 0.0 }
 0x126   : > { %v840_v29 = vadd.f32 1e-06, %v832_v27  ;;  %v1159_v48 = vmul.f32 %v2941_v38, %v2941_v38  ;;  %2046 = vmatpush.msra.mxu2 %v715_v21  ;;  %v891_v27 = vmul.f32 %v2971_v20, %v2971_v20 }
 0x127   : > { %v1165_v33 = vsel %vm560_vm0, %v1155_v30, 0.0  ;;  %1976 = vmatmul.msk.f32.vlgmr.msra.gmra.mxu2 %vm560_vm0, %v709_v22  ;;  %762 = vmatpush.msra.mxu0 %v715_v21  ;;  %v2979_v30 = vmul.f32 %v852_v25, %v820_v17  ;;  %v864_v34 = vsel %vm560_vm0, %v852_v25, 0.0 }
 0x128   : > { %v848_v32 = vmul.f32 %v840_v29, %v2900_v45  ;;  %1166 = vadd.xlane.f32.xlu2 %v1165_v33  ;;  %v1177_v43 = vsel %vm560_vm0, %v1159_v48, 0.0  ;;  %v821_v29 = vmul.f32 %v2900_v45, %v810_v23  ;;  %v901_v33 = vsel %vm560_vm0, %v891_v27, 0.0 }
 0x12a   : > { %v1120_v35 = vmul.f32 %v848_v32, %v848_v32 }
 0x12b   : > { %v704_v37 = vpop.f32.mrf.mxu1 }
 0x12c   : > { %v833_v40 = vmax.f32 %v704_v37, 0.0  ;;  %1138 = vadd.xlane.f32.xlu0 %v1137_v36  ;;  %v1140_v44 = vsel %vm560_vm0, %v1120_v35, 0.0  ;;  %v2946_v46 = vmul.f32 %v1120_v35, %v848_v32  ;;  %v617_v32 = vpop.f32.mrf.mxu3  ;;  %v710_v35 = vld [vmem:[%s2849_s18 + $0x18] sm:$0xff]  ;;  %v892_v36 = vmul.f32 %v2979_v30, %v2979_v30 }
 0x12d   : > { %1175 = vadd.xlane.f32.xlu1 %v1174_v39  ;;  %v811_v37 = vadd.f32 1e-06, %v803_v31  ;;  %v853_v39 = vmul.f32 %v821_v29, %v821_v29 }
 0x12e   : > { %v841_v42 = vadd.f32 1e-06, %v833_v40  ;;  %v1160_v52 = vmul.f32 %v2946_v46, %v2946_v46  ;;  %v904_v40 = vsel %vm560_vm0, %v892_v36, 0.0 }
 0x12f   : > { %1977 = vmatmul.msk.f32.gmra.mxu2 %vm560_vm0, %v710_v35  ;;  %v822_v41 = vmul.f32 %v2900_v45, %v811_v37  ;;  %v867_v47 = vsel %vm560_vm0, %v853_v39, 0.0 }
 0x130   : > { %v849_v49 = vmul.f32 %v841_v42, %v2900_v45  ;;  %1141 = vadd.xlane.f32.xlu2 %v1140_v44  ;;  %v1180_v59 = vsel %vm560_vm0, %v1160_v52, 0.0  ;;  %v2989_v42 = vmul.f32 %v853_v39, %v821_v29  ;;  %v804_v44 = vmax.f32 %v617_v32, 0.0 }
 0x132   : > { %v1121_v53 = vmul.f32 %v849_v49, %v849_v49  ;;  %v893_v51 = vmul.f32 %v2989_v42, %v2989_v42  ;;  %v812_v52 = vadd.f32 1e-06, %v804_v44 }
 0x134   : > { %v1143_v55 = vsel %vm560_vm0, %v1121_v53, 0.0  ;;  %v2955_v56 = vmul.f32 %v1121_v53, %v849_v49  ;;  %1178 = vadd.xlane.f32.xlu0 %v1177_v43  ;;  %v620_v48 = vpop.f32.mrf.mxu3  ;;  %v711_v49 = vld [vmem:[%s2849_s18 + $0x20] sm:$0xff]  ;;  %v854_v53 = vmul.f32 %v822_v41, %v822_v41  ;;  %v907_v43 = vsel %vm560_vm0, %v893_v51, 0.0 }
 0x135   : > { %1144 = vadd.xlane.f32.xlu1 %v1143_v55  ;;  %v823_v55 = vmul.f32 %v2900_v45, %v812_v52  ;;  %v805_v58 = vmax.f32 %v620_v48, 0.0 }
 0x136   : > { %v1161_v62 = vmul.f32 %v2955_v56, %v2955_v56  ;;  %v2998_v57 = vmul.f32 %v854_v53, %v822_v41 }
 0x137   : > { %1978 = vmatmul.msk.f32.gmra.mxu2 %vm560_vm0, %v711_v49  ;;  %v855_v63 = vmul.f32 %v823_v55, %v823_v55 }
 0x138   : > { %1181 = vadd.xlane.f32.xlu2 %v1180_v59  ;;  %v1183_v50 = vsel %vm560_vm0, %v1161_v62, 0.0  ;;  %v870_v59 = vsel %vm560_vm0, %v854_v53, 0.0  ;;  %v894_v61 = vmul.f32 %v2998_v57, %v2998_v57  ;;  %v813_v62 = vadd.f32 1e-06, %v805_v58 }
 0x139   : > { %v873_v5 = vsel %vm560_vm0, %v855_v63, 0.0 }
 0x13a   : > { %v910_v2 = vsel %vm560_vm0, %v894_v61, 0.0  ;;  %v824_v3 = vmul.f32 %v2900_v45, %v813_v62 }
 0x13c   : > { %1184 = vadd.xlane.f32.xlu0 %v1183_v50  ;;  %v623_v0 = vpop.f32.mrf.mxu3  ;;  %v3007_v50 = vmul.f32 %v855_v63, %v823_v55  ;;  %v856_v9 = vmul.f32 %v824_v3, %v824_v3 }
 0x13d   : > { %v806_v4 = vmax.f32 %v623_v0, 0.0 }
 0x13e   : > { %v895_v7 = vmul.f32 %v3007_v50, %v3007_v50  ;;  %v3016_v13 = vmul.f32 %v856_v9, %v824_v3  ;;  %v876_v14 = vsel %vm560_vm0, %v856_v9, 0.0 }
 0x13f   : > { %1979 = vmatmul.msk.f32.gmra.mxu2 %vm560_vm0, %v712_v60  ;;  %v814_v8 = vadd.f32 1e-06, %v806_v4 }
 0x140   : > { %859 = vadd.xlane.f32.xlu2 %v858_v10  ;;  %v713_v10 = vld [vmem:[%s2849_s18 + $0x30] sm:$0xff]  ;;  %v913_v11 = vsel %vm560_vm0, %v895_v7, 0.0  ;;  %v896_v15 = vmul.f32 %v3016_v13, %v3016_v13 }
 0x141   : > { %v825_v12 = vmul.f32 %v2900_v45, %v814_v8 }
 0x143   : > { %v857_v17 = vmul.f32 %v825_v12, %v825_v12 }
 0x144   : > { %899 = vadd.xlane.f32.xlu0 %v898_v19  ;;  %v916_v19 = vsel %vm560_vm0, %v896_v15, 0.0 }
 0x145   : > { %v3024_v21 = vmul.f32 %v857_v17, %v825_v12  ;;  %v879_v45 = vsel %vm560_vm0, %v857_v17, 0.0 }
 0x147   : > { %1980 = vmatmul.msk.f32.gmra.mxu2 %vm560_vm0, %v713_v10  ;;  %v897_v22 = vmul.f32 %v3024_v21, %v3024_v21 }
 0x148   : > { %862 = vadd.xlane.f32.xlu2 %v861_v26 }
 0x149   : > { %v919_v23 = vsel %vm560_vm0, %v897_v22, 0.0 }
 0x14c   : > { %902 = vadd.xlane.f32.xlu0 %v901_v33 }
 0x14f   : > { %1981 = vmatmul.msk.f32.gmra.mxu2 %vm560_vm0, %v714_v18 }
 0x150   : > { %865 = vadd.xlane.f32.xlu2 %v864_v34 }
 0x154   : > { %905 = vadd.xlane.f32.xlu0 %v904_v40 }
 0x158   : > { %868 = vadd.xlane.f32.xlu2 %v867_v47 }
 0x15c   : > { %908 = vadd.xlane.f32.xlu0 %v907_v43 }
 0x160   : > { %871 = vadd.xlane.f32.xlu2 %v870_v59 }
 0x164   : > { %911 = vadd.xlane.f32.xlu0 %v910_v2 }
 0x168   : > { %874 = vadd.xlane.f32.xlu2 %v873_v5 }
 0x16c   : > { %914 = vadd.xlane.f32.xlu0 %v913_v11 }
 0x170   : > { %877 = vadd.xlane.f32.xlu2 %v876_v14 }
 0x174   : > { %917 = vadd.xlane.f32.xlu0 %v916_v19 }
 0x178   : > { %880 = vadd.xlane.f32.xlu2 %v879_v45 }
 0x17c   : > { %920 = vadd.xlane.f32.xlu0 %v919_v23 }
 0x180   : > { %v3030_v25 = vpop.xlane.xlu1 %1129 }
 0x181   : > { %2166 = vrsqrt.f32 %v3030_v25  ;;  %vm1217_vm2 = vcmp.eq.f32.partialorder %v3030_v25, inf  ;;  %v1220_v12 = vand.u32 2147483648, %v3030_v25  ;;  %vm1219_vm6 = vcmp.eq.f32.partialorder %v3030_v25, 0.0 }
 0x184   : > { %v1170_v26 = vpop.xlane.xlu0 %1169 }
 0x185   : > { %2168 = vrsqrt.f32 %v1170_v26  ;;  %vm1308_vm3 = vweird.f32 %v1170_v26 }
 0x187   : > { %v2167_v27 = vpop.eup %2166 }
 0x188   : > { %v1211_v29 = vmul.f32 %v2167_v27, %v3030_v25  ;;  %v3034_v31 = vpop.xlane.xlu2 %1132 }
 0x189   : > { %2170 = vrsqrt.f32 %v3034_v31  ;;  %v1232_v17 = vand.u32 2147483648, %v3034_v31  ;;  %vm1229_vm8 = vcmp.eq.f32.partialorder %v3034_v31, inf  ;;  %vm1231_vm12 = vcmp.eq.f32.partialorder %v3034_v31, 0.0 }
 0x18a   : > { %v1212_v32 = vmul.f32 %v2167_v27, %v1211_v29 }
 0x18b   : > { %v3037_v33 = vpop.eup %2168 }
 0x18c   : > { %v1303_v34 = vmul.f32 %v3037_v33, %v1170_v26  ;;  %v1213_v35 = vmul.f32 0.5, %v1212_v32  ;;  %vm1309_vm1 = vweird.f32 %v3037_v33 }
 0x18d   : > { %vm3079_vm4 = vmor %vm1308_vm3, %vm1309_vm1 }
 0x18e   : > { %v1304_v37 = vmul.f32 %v3037_v33, %v1303_v34  ;;  %v1214_v47 = vsub.f32 1.5, %v1213_v35 }
 0x18f   : > { %v2171_v36 = vpop.eup %2170  ;;  %v3047_v44 = vpop.xlane.xlu0 %1123 }
 0x190   : > { %v3041_v39 = vpop.xlane.xlu2 %1172  ;;  %v3043_v40 = vpop.xlane.xlu1 %1135  ;;  %v1223_v41 = vmul.f32 %v2171_v36, %v3034_v31  ;;  %v1305_v48 = vmul.f32 0.5, %v1304_v37  ;;  %v1215_v51 = vmul.f32 %v2167_v27, %v1214_v47  ;;  %vm1193_vm5 = vcmp.eq.f32.partialorder %v3047_v44, inf }
 0x191   : > { %2172 = vrsqrt.f32 %v3041_v39  ;;  %vm1318_vm7 = vweird.f32 %v3041_v39  ;;  %vm1195_vm9 = vcmp.eq.f32.partialorder %v3047_v44, 0.0  ;;  %v1196_v47 = vand.u32 2147483648, %v3047_v44 }
 0x192   : > { %2174 = vrsqrt.f32 %v3043_v40  ;;  %v1224_v49 = vmul.f32 %v2171_v36, %v1223_v41  ;;  %v1306_v43 = vsub.f32 1.5, %v1305_v48  ;;  %v1216_v63 = vmul.f32 %v1215_v51, %v3030_v25 }
 0x193   : > { %2176 = vrsqrt.f32 %v3047_v44  ;;  %vm1241_vm3 = vcmp.eq.f32.partialorder %v3043_v40, inf }
 0x194   : > { %v1225_v60 = vmul.f32 0.5, %v1224_v49  ;;  %v1307_v3 = vmul.f32 %v3037_v33, %v1306_v43  ;;  %v1218_v8 = vsel %vm1217_vm2, %v3030_v25, %v1216_v63  ;;  %v1244_v49 = vand.u32 2147483648, %v3043_v40 }
 0x195   : > { %v1221_v26 = vsel %vm1219_vm6, %v1220_v12, %v1218_v8 }
 0x196   : > { %v1226_v9 = vsub.f32 1.5, %v1225_v60  ;;  %v1311_v19 = vsel %vm3079_vm4, %v3037_v33, %v1307_v3  ;;  %v707_v60 = vld [vmem:[%s2849_s18] sm:$0xff] }
 0x197   : > { %v3051_v52 = vpop.eup %2172  ;;  %v3062_v62 = vpop.xlane.xlu0 %1126  ;;  %v1364_v48 = vmul.f32 %v1311_v19, %v1221_v26  ;;  %1974 = vmatmul.msk.f32.vlgmr.msra.gmra.mxu0 %vm560_vm0, %v707_v60 }
 0x198   : > { %v3053_v53 = vpop.eup %2174  ;;  %v1313_v55 = vmul.f32 %v3051_v52, %v3041_v39  ;;  %v3057_v58 = vpop.xlane.xlu1 %1163  ;;  %v1227_v32 = vmul.f32 %v2171_v36, %v1226_v9  ;;  %vm1319_vm10 = vweird.f32 %v3051_v52  ;;  %vm1205_vm14 = vcmp.eq.f32.partialorder %v3062_v62, inf }
 0x199   : > { %v2177_v59 = vpop.eup %2176  ;;  %v1235_v61 = vmul.f32 %v3053_v53, %v3043_v40  ;;  %2178 = vrsqrt.f32 %v3057_v58  ;;  %vm1288_vm11 = vweird.f32 %v3057_v58  ;;  %v3129_v8 = vmul.f32 %v1364_v48, %v2906_v54  ;;  %vm3144_vm1 = vmor %vm1318_vm7, %vm1319_vm10 }
 0x19a   : > { %v1314_v0 = vmul.f32 %v3051_v52, %v1313_v55  ;;  %v1187_v2 = vmul.f32 %v2177_v59, %v3047_v44  ;;  %2180 = vrsqrt.f32 %v3062_v62  ;;  %vm1207_vm15 = vcmp.eq.f32.partialorder %v3062_v62, 0.0 }
 0x19b   : > { %v3070_v4 = vpop.xlane.xlu2 %1166  ;;  %v1236_v7 = vmul.f32 %v3053_v53, %v1235_v61  ;;  %v1228_v61 = vmul.f32 %v1227_v32, %v3034_v31 }
 0x19c   : > { %v1188_v5 = vmul.f32 %v2177_v59, %v1187_v2  ;;  %2182 = vrsqrt.f32 %v3070_v4  ;;  %v1315_v10 = vmul.f32 0.5, %v1314_v0 }
 0x19d   : > { %v1237_v25 = vmul.f32 0.5, %v1236_v7  ;;  %v1230_v26 = vsel %vm1229_vm8, %v3034_v31, %v1228_v61 }
 0x19e   : > { %v1189_v11 = vmul.f32 0.5, %v1188_v5  ;;  %v1316_v33 = vsub.f32 1.5, %v1315_v10 }
 0x19f   : > { %v3077_v14 = vpop.eup %2178  ;;  %v3100_v29 = vpop.xlane.xlu0 %1138  ;;  %v1238_v3 = vsub.f32 1.5, %v1237_v25 }
 0x1a0   : > { %v3086_v18 = vpop.eup %2180  ;;  %v1283_v45 = vmul.f32 %v3077_v14, %v3057_v58  ;;  %v3094_v22 = vpop.xlane.xlu1 %1175  ;;  %v1190_v23 = vsub.f32 1.5, %v1189_v11  ;;  %v1317_v63 = vmul.f32 %v3051_v52, %v1316_v33  ;;  %vm1289_vm13 = vweird.f32 %v3077_v14 }
 0x1a1   : > { %v1199_v27 = vmul.f32 %v3086_v18, %v3062_v62  ;;  %2184 = vrsqrt.f32 %v3094_v22  ;;  %vm1290_vm2 = vmor %vm1288_vm11, %vm1289_vm13  ;;  %vm1328_vm8 = vweird.f32 %v3094_v22  ;;  %vm1243_vm11 = vcmp.eq.f32.partialorder %v3043_v40, 0.0 }
 0x1a2   : > { %v1284_v34 = vmul.f32 %v3077_v14, %v1283_v45  ;;  %2186 = vrsqrt.f32 %v3100_v29  ;;  %v1191_v35 = vmul.f32 %v2177_v59, %v1190_v23  ;;  %v3105_v37 = vpop.eup %2182  ;;  %v1321_v39 = vsel %vm3144_vm1, %v3051_v52, %v1317_v63 }
 0x1a3   : > { %v1200_v41 = vmul.f32 %v3086_v18, %v1199_v27  ;;  %v1293_v51 = vmul.f32 %v3105_v37, %v3070_v4  ;;  %v3113_v43 = vpop.xlane.xlu2 %1141  ;;  %v1239_v27 = vmul.f32 %v3053_v53, %v1238_v3  ;;  %vm1299_vm4 = vweird.f32 %v3105_v37  ;;  %v708_v3 = vld [vmem:[%s2849_s18 + $0x8] sm:$0xff] }
 0x1a4   : > { %v1285_v36 = vmul.f32 0.5, %v1284_v34  ;;  %v1192_v55 = vmul.f32 %v1191_v35, %v3047_v44  ;;  %2188 = vrsqrt.f32 %v3113_v43  ;;  %vm1265_vm7 = vcmp.eq.f32.partialorder %v3113_v43, inf  ;;  %1975 = vmatmul.msk.f32.gmra.mxu0 %vm560_vm0, %v708_v3 }
 0x1a5   : > { %v1201_v59 = vmul.f32 0.5, %v1200_v41  ;;  %v1294_v2 = vmul.f32 %v3105_v37, %v1293_v51  ;;  %v1233_v51 = vsel %vm1231_vm12, %v1232_v17, %v1230_v26  ;;  %v1240_v61 = vmul.f32 %v1239_v27, %v3043_v40  ;;  %v3225_v26 = vld [vmem:[#allocation13 + $0x30] sm:$0xff] }
 0x1a6   : > { %v1286_v0 = vsub.f32 1.5, %v1285_v36  ;;  %v1194_v15 = vsel %vm1193_vm5, %v3047_v44, %v1192_v55  ;;  %vm1298_vm5 = vweird.f32 %v3070_v4  ;;  %v1365_v60 = vmul.f32 %v1321_v39, %v1233_v51 }
 0x1a7   : > { %v3124_v5 = vpop.eup %2184  ;;  %v1202_v7 = vsub.f32 1.5, %v1201_v59  ;;  %v1295_v11 = vmul.f32 0.5, %v1294_v2  ;;  %v3152_v23 = vpop.xlane.xlu0 %1178  ;;  %v1197_v33 = vsel %vm1195_vm9, %v1196_v47, %v1194_v15  ;;  %v1208_v47 = vand.u32 2147483648, %v3062_v62  ;;  %vm3192_vm6 = vmor %vm1298_vm5, %vm1299_vm4 }
 0x1a8   : > { %v3131_v9 = vpop.eup %2186  ;;  %v1287_v10 = vmul.f32 %v3077_v14, %v1286_v0  ;;  %v3134_v12 = vpop.xlane.xlu1 %1144  ;;  %v1323_v19 = vmul.f32 %v3124_v5, %v3094_v22  ;;  %vm1267_vm9 = vcmp.eq.f32.partialorder %v3113_v43, 0.0  ;;  %vm1329_vm10 = vweird.f32 %v3124_v5 }
 0x1a9   : > { %v1247_v45 = vmul.f32 %v3131_v9, %v3100_v29  ;;  %2190 = vrsqrt.f32 %v3134_v12  ;;  %v1296_v25 = vsub.f32 1.5, %v1295_v11  ;;  %v1203_v34 = vmul.f32 %v3086_v18, %v1202_v7  ;;  %v3212_v7 = vld [vmem:[#allocation13 + $0x38] sm:$0xff] }
 0x1aa   : > { %2192 = vrsqrt.f32 %v3152_v23  ;;  %v2189_v32 = vpop.eup %2188  ;;  %v1291_v52 = vsel %vm1290_vm2, %v3077_v14, %v1287_v10  ;;  %v1324_v36 = vmul.f32 %v3124_v5, %v1323_v19  ;;  %1447 = vmatpush.msrb.mxu3 %v3212_v7  ;;  %v1268_v19 = vand.u32 2147483648, %v3113_v43 }
 0x1ab   : > { %v1297_v58 = vmul.f32 %v3105_v37, %v1296_v25  ;;  %v1248_v35 = vmul.f32 %v3131_v9, %v1247_v45  ;;  %v1259_v41 = vmul.f32 %v2189_v32, %v3113_v43  ;;  %v3176_v48 = vpop.xlane.xlu2 %1181  ;;  %v1362_v53 = vmul.f32 %v1291_v52, %v1197_v33 }
 0x1ac   : > { %2194 = vrsqrt.f32 %v3176_v48  ;;  %v1204_v44 = vmul.f32 %v1203_v34, %v3062_v62  ;;  %v1325_v10 = vmul.f32 0.5, %v1324_v36  ;;  %1448 = vmatpush.msrb.mxu3 %v3225_v26  ;;  %v3237_v33 = vsel %vm1241_vm3, %v3043_v40, %v1240_v61 }
 0x1ad   : > { %v1260_v14 = vmul.f32 %v2189_v32, %v1259_v41  ;;  %v3184_v18 = vmul.f32 %v1362_v53, %v2922_v16  ;;  %v3201_v16 = vsel %vm560_vm0, %v3129_v8, 0.0  ;;  %v1301_v17 = vsel %vm3192_vm6, %v3105_v37, %v1297_v58  ;;  %vm3308_vm6 = vmor %vm1328_vm8, %vm1329_vm10 }
 0x1ae   : > { %v1206_v4 = vsel %vm1205_vm14, %v3062_v62, %v1204_v44  ;;  %v1249_v63 = vmul.f32 0.5, %v1248_v35  ;;  %v3231_v62 = vmul.f32 %v1365_v60, %v2913_v1  ;;  %v3245_v1 = vld [vmem:[#allocation13 + $0x28] sm:$0xff]  ;;  %v1326_v53 = vsub.f32 1.5, %v1325_v10 }
 0x1af   : > { %v2191_v55 = vpop.eup %2190  ;;  %v1261_v0 = vmul.f32 0.5, %v1260_v14  ;;  %1488 = vxpose.xlu1.b32.start [1/8] (short) (narrow) %v3184_v18, 64  ;;  %v3217_v15 = vpop.xlane.xlu0 %1184  ;;  %v1209_v37 = vsel %vm1207_vm15, %v1208_v47, %v1206_v4  ;;  %1449 = vmatpush.msrb.mxu3 %v3245_v1  ;;  %vm1253_vm12 = vcmp.eq.f32.partialorder %v3100_v29, inf  ;;  %vm1277_vm13 = vcmp.eq.f32.partialorder %v3134_v12, inf  ;;  %v3255_v14 = vld [vmem:[#allocation13 + $0x20] sm:$0xff] }
 0x1b0   : > { %v3204_v31 = vpop.eup %2192  ;;  %v1271_v2 = vmul.f32 %v2191_v55, %v3134_v12  ;;  %2196 = vrsqrt.f32 %v3217_v15  ;;  %v1363_v27 = vmul.f32 %v1301_v17, %v1209_v37  ;;  %v1250_v41 = vsub.f32 1.5, %v1249_v63 }
 0x1b1   : > { %v1333_v11 = vmul.f32 %v3204_v31, %v3152_v23  ;;  %v1262_v54 = vsub.f32 1.5, %v1261_v0  ;;  %vm1338_vm14 = vweird.f32 %v3152_v23  ;;  %vm1348_vm15 = vweird.f32 %v3176_v48  ;;  %1450 = vmatpush.msrb.mxu3 %v3255_v14 }
 0x1b2   : > { %v1272_v45 = vmul.f32 %v2191_v55, %v1271_v2  ;;  %v3227_v39 = vpop.eup %2194  ;;  %v1371_v47 = vmul.f32 %v1363_v27, %v2932_v28  ;;  %vm1279_vm1 = vcmp.eq.f32.partialorder %v3134_v12, 0.0  ;;  %v1280_v51 = vand.u32 2147483648, %v3134_v12 }
 0x1b3   : > { %v1334_v25 = vmul.f32 %v3204_v31, %v1333_v11  ;;  %v1263_v52 = vmul.f32 %v2189_v32, %v1262_v54  ;;  %v1343_v34 = vmul.f32 %v3227_v39, %v3176_v48  ;;  %v3243_v35 = vpop.xlane.xlu2 %859  ;;  %v1251_v28 = vmul.f32 %v3131_v9, %v1250_v41 }
 0x1b4   : > { %v1273_v58 = vmul.f32 0.5, %v1272_v45  ;;  %2198 = vrsqrt.f32 %v3243_v35  ;;  %v1327_v17 = vmul.f32 %v3124_v5, %v1326_v53  ;;  %vm1349_vm2 = vweird.f32 %v3227_v39 }
 0x1b5   : > { %v1335_v36 = vmul.f32 0.5, %v1334_v25  ;;  %v1344_v32 = vmul.f32 %v3227_v39, %v1343_v34  ;;  %v1264_v4 = vmul.f32 %v1263_v52, %v3113_v43  ;;  %vm1339_vm3 = vweird.f32 %v3204_v31  ;;  %vm3293_vm5 = vmor %vm1348_vm15, %vm1349_vm2  ;;  %v3301_v34 = vld [vmem:[#allocation13 + $0x10] sm:$0xff] }
 0x1b6   : > { %v1274_v44 = vsub.f32 1.5, %v1273_v58  ;;  %v3262_v59 = vpop.eup %2196  ;;  %v1386_v10 = vsel %vm560_vm0, %v3184_v18, 0.0  ;;  %vm1358_vm4 = vweird.f32 %v3217_v15  ;;  %v1387_v54 = vsel %vm560_vm0, %v1371_v47, 0.0  ;;  %vm3323_vm8 = vmor %vm1338_vm14, %vm1339_vm3 }
 0x1b7   : > { %v1345_v60 = vmul.f32 0.5, %v1344_v32  ;;  %1489 = vxpose.xlu1.b32.cont [2/8] (short) (narrow) %v1371_v47, 64  ;;  %v1336_v63 = vsub.f32 1.5, %v1335_v36  ;;  %v1353_v0 = vmul.f32 %v3262_v59, %v3217_v15  ;;  %v3270_v2 = vpop.xlane.xlu0 %899  ;;  %v1266_v18 = vsel %vm1265_vm7, %v3113_v43, %v1264_v4  ;;  %v3333_v4 = vld [vmem:[#allocation13 + $0x8] sm:$0xff] }
 0x1b8   : > { %v1275_v61 = vmul.f32 %v2191_v55, %v1274_v44  ;;  %2200 = vrsqrt.f32 %v3270_v2  ;;  %v3276_v55 = vld [vmem:[#allocation13 + $0x18] sm:$0xff]  ;;  %v1252_v58 = vmul.f32 %v1251_v28, %v3100_v29  ;;  %vm1359_vm7 = vweird.f32 %v3262_v59 }
 0x1b9   : > { %v1346_v3 = vsub.f32 1.5, %v1345_v60  ;;  %v1354_v37 = vmul.f32 %v3262_v59, %v1353_v0  ;;  %1451 = vmatpush.msrb.mxu3 %v3276_v55  ;;  %v1337_v48 = vmul.f32 %v3204_v31, %v1336_v63  ;;  %v1331_v36 = vsel %vm3308_vm6, %v3124_v5, %v1327_v17  ;;  %vm3352_vm10 = vmor %vm1358_vm4, %vm1359_vm7 }
 0x1ba   : > { %v3278_v9 = vpop.eup %2198  ;;  %v1276_v11 = vmul.f32 %v1275_v61, %v3134_v12  ;;  %v1388_v44 = vadd.f32 %v1387_v54, %v1386_v10  ;;  %v1245_v47 = vsel %vm1243_vm11, %v1244_v49, %v3237_v33  ;;  %v1269_v5 = vsel %vm1267_vm9, %v1268_v19, %v1266_v18  ;;  %v3357_v19 = vld [vmem:[#allocation13] sm:$0xff] }
 0x1bb   : > { %v1347_v45 = vmul.f32 %v3227_v39, %v1346_v3  ;;  %v923_v27 = vmul.f32 %v3278_v9, %v3243_v35  ;;  %v3299_v52 = vpop.xlane.xlu2 %862  ;;  %v1355_v53 = vmul.f32 0.5, %v1354_v37  ;;  %1452 = vmatpush.msrb.mxu3 %v3301_v34  ;;  %vm1255_vm9 = vcmp.eq.f32.partialorder %v3100_v29, 0.0 }
 0x1bc   : > { %2202 = vrsqrt.f32 %v3299_v52  ;;  %v1278_v60 = vsel %vm1277_vm13, %v3134_v12, %v1276_v11  ;;  %v1256_v33 = vand.u32 2147483648, %v3100_v29  ;;  %v1341_v15 = vsel %vm3323_vm8, %v3204_v31, %v1337_v48 }
 0x1bd   : > { %v924_v32 = vmul.f32 %v3278_v9, %v923_v27  ;;  %v1351_v23 = vsel %vm3293_vm5, %v3227_v39, %v1347_v45  ;;  %v1356_v61 = vsub.f32 1.5, %v1355_v53  ;;  %1453 = vmatpush.msrb.mxu3 %v3333_v4  ;;  %v1254_v39 = vsel %vm1253_vm12, %v3100_v29, %v1252_v58 }
 0x1be   : > { %v3346_v40 = vpop.eup %2200  ;;  %v1366_v63 = vmul.f32 %v1331_v36, %v1245_v47  ;;  %v1281_v0 = vsel %vm1279_vm1, %v1280_v51, %v1278_v60  ;;  %v1390_v29 = vadd.f32 %v3201_v16, %v1388_v44  ;;  %v1368_v3 = vmul.f32 %v1351_v23, %v1269_v5 }
 0x1bf   : > { %v925_v43 = vmul.f32 0.5, %v924_v32  ;;  %1490 = vxpose.xlu1.b32.cont [3/8] (short) (narrow) %v3129_v8, 64  ;;  %v1357_v28 = vmul.f32 %v3262_v59, %v1356_v61  ;;  %v1019_v17 = vmul.f32 %v3346_v40, %v3270_v2  ;;  %v3370_v8 = vpop.xlane.xlu0 %902  ;;  %1454 = vmatpush.msrb.mxu3 %v3357_v19  ;;  %v1257_v37 = vsel %vm1255_vm9, %v1256_v33, %v1254_v39 }
 0x1c0   : > { %2204 = vrsqrt.f32 %v3370_v8  ;;  %v1367_v12 = vmul.f32 %v1341_v15, %v1257_v37  ;;  %v1391_v16 = vsel %vm560_vm0, %v3231_v62, 0.0  ;;  %v1374_v25 = vmul.f32 %v1366_v63, %v2928_v24 }
 0x1c1   : > { %v1361_v10 = vsel %vm3352_vm10, %v3262_v59, %v1357_v28  ;;  %v1020_v11 = vmul.f32 %v3346_v40, %v1019_v17  ;;  %v926_v54 = vsub.f32 1.5, %v925_v43  ;;  %v1392_v58 = vadd.f32 %v1391_v16, %v1390_v29 }
 0x1c2   : > { %v2203_v31 = vpop.eup %2202  ;;  %v1369_v51 = vmul.f32 %v1361_v10, %v1281_v0  ;;  %v3391_v59 = vmul.f32 %v1368_v3, %v2946_v46  ;;  %v3394_v48 = vmul.f32 %v1367_v12, %v2941_v38  ;;  %v1393_v46 = vsel %vm560_vm0, %v1374_v25, 0.0 }
 0x1c3   : > { %v935_v18 = vmul.f32 %v2203_v31, %v3299_v52  ;;  %v3384_v45 = vpop.xlane.xlu2 %865  ;;  %v1021_v41 = vmul.f32 0.5, %v1020_v11  ;;  %v927_v36 = vmul.f32 %v3278_v9, %v926_v54  ;;  %v1394_v38 = vadd.f32 %v1393_v46, %v1392_v58 }
 0x1c4   : > { %2206 = vrsqrt.f32 %v3384_v45  ;;  %v3401_v32 = vmul.f32 %v1369_v51, %v2955_v56  ;;  %v1395_v47 = vsel %vm560_vm0, %v3394_v48, 0.0  ;;  %v1397_v56 = vsel %vm560_vm0, %v3391_v59, 0.0 }
 0x1c5   : > { %v936_v27 = vmul.f32 %v2203_v31, %v935_v18  ;;  %v1022_v5 = vsub.f32 1.5, %v1021_v41  ;;  %v928_v23 = vmul.f32 %v927_v36, %v3243_v35  ;;  %v1396_v43 = vadd.f32 %v1395_v47, %v1394_v38 }
 0x1c6   : > { %v3396_v53 = vpop.eup %2204  ;;  %v1399_v39 = vsel %vm560_vm0, %v3401_v32, 0.0  ;;  %vm929_vm11 = vcmp.eq.f32.partialorder %v3243_v35, inf  ;;  %vm1025_vm12 = vweird.f32 %v3346_v40  ;;  %v932_v11 = vand.u32 2147483648, %v3243_v35 }
 0x1c7   : > { %v937_v22 = vmul.f32 0.5, %v936_v27  ;;  %1491 = vxpose.xlu1.b32.cont [4/8] (short) (narrow) %v3231_v62, 64  ;;  %v1029_v24 = vmul.f32 %v3396_v53, %v3370_v8  ;;  %v3405_v44 = vpop.xlane.xlu0 %905  ;;  %v1398_v15 = vadd.f32 %v1397_v56, %v1396_v43  ;;  %v1023_v28 = vmul.f32 %v3346_v40, %v1022_v5 }
 0x1c8   : > { %2208 = vrsqrt.f32 %v3405_v44  ;;  %v930_v0 = vsel %vm929_vm11, %v3243_v35, %v928_v23  ;;  %vm1024_vm13 = vweird.f32 %v3270_v2  ;;  %vm931_vm14 = vcmp.eq.f32.partialorder %v3243_v35, 0.0  ;;  %v3442_v35 = vpop.f32.mrf.mxu2 }
 0x1c9   : > { %v1030_v62 = vmul.f32 %v3396_v53, %v1029_v24  ;;  %v938_v60 = vsub.f32 1.5, %v937_v22  ;;  %v1400_v10 = vadd.f32 %v1399_v39, %v1398_v15  ;;  %vm1026_vm15 = vmor %vm1024_vm13, %vm1025_vm12  ;;  %vm941_vm1 = vcmp.eq.f32.partialorder %v3299_v52, inf }
 0x1ca   : > { %v2207_v9 = vpop.eup %2206  ;;  %v1027_v51 = vsel %vm1026_vm15, %v3346_v40, %v1023_v28  ;;  %vm1035_vm2 = vweird.f32 %v3396_v53  ;;  %vm1034_vm3 = vweird.f32 %v3370_v8  ;;  %vm943_vm4 = vcmp.eq.f32.partialorder %v3299_v52, 0.0 }
 0x1cb   : > { %v947_v61 = vmul.f32 %v2207_v9, %v3384_v45  ;;  %v3416_v49 = vpop.xlane.xlu2 %868  ;;  %v1031_v17 = vmul.f32 0.5, %v1030_v62  ;;  %v939_v29 = vmul.f32 %v2203_v31, %v938_v60  ;;  %v1401_v18 = vrot.slane %v1400_v10, 4  ;;  %vm3458_vm5 = vmor %vm1034_vm3, %vm1035_vm2 }
 0x1cc   : > { %2210 = vrsqrt.f32 %v3416_v49  ;;  %v933_v31 = vsel %vm931_vm14, %v932_v11, %v930_v0  ;;  %v944_v60 = vand.u32 2147483648, %v3299_v52  ;;  %vm953_vm6 = vcmp.eq.f32.partialorder %v3384_v45, inf }
 0x1cd   : > { %v948_v33 = vmul.f32 %v2207_v9, %v947_v61  ;;  %v1032_v16 = vsub.f32 1.5, %v1031_v17  ;;  %v940_v2 = vmul.f32 %v939_v29, %v3299_v52  ;;  %v1402_v36 = vadd.f32 %v1401_v18, %v1400_v10 }
 0x1ce   : > { %v3424_v63 = vpop.eup %2208  ;;  %v1098_v22 = vmul.f32 %v1027_v51, %v933_v31  ;;  %vm1044_vm7 = vweird.f32 %v3405_v44  ;;  %v956_v18 = vand.u32 2147483648, %v3384_v45  ;;  %vm955_vm10 = vcmp.eq.f32.partialorder %v3384_v45, 0.0 }
 0x1cf   : > { %v949_v3 = vmul.f32 0.5, %v948_v33  ;;  %1492 = vxpose.xlu1.b32.cont [5/8] (short) (narrow) %v1374_v25, 64  ;;  %v1039_v37 = vmul.f32 %v3424_v63, %v3405_v44  ;;  %v3431_v54 = vpop.xlane.xlu0 %908  ;;  %v1403_v46 = vrot.slane %v1402_v36, 2  ;;  %v1033_v40 = vmul.f32 %v3396_v53, %v1032_v16 }
 0x1d0   : > { %2212 = vrsqrt.f32 %v3431_v54  ;;  %v942_v5 = vsel %vm941_vm1, %v3299_v52, %v940_v2  ;;  %v3463_v33 = vmul.f32 %v1098_v22, %v2964_v6  ;;  %vm1045_vm8 = vweird.f32 %v3424_v63 }
 0x1d1   : > { %v1040_v25 = vmul.f32 %v3424_v63, %v1039_v37  ;;  %v950_v27 = vsub.f32 1.5, %v949_v3  ;;  %v1404_v23 = vadd.f32 %v1403_v46, %v1402_v36  ;;  %v945_v15 = vsel %vm943_vm4, %v944_v60, %v942_v5  ;;  %vm3490_vm9 = vmor %vm1044_vm7, %vm1045_vm8 }
 0x1d2   : > { %v2211_v12 = vpop.eup %2210  ;;  %v1037_v8 = vsel %vm3458_vm5, %v3396_v53, %v1033_v40  ;;  %v3480_v53 = vpop.f32.mrf.mxu2  ;;  %vm965_vm11 = vcmp.eq.f32.partialorder %v3416_v49, inf  ;;  %vm1054_vm12 = vweird.f32 %v3431_v54  ;;  %v968_v60 = vand.u32 2147483648, %v3416_v49 }
 0x1d3   : > { %v959_v58 = vmul.f32 %v2211_v12, %v3416_v49  ;;  %v3439_v41 = vpop.xlane.xlu2 %871  ;;  %v1041_v38 = vmul.f32 0.5, %v1040_v25  ;;  %v951_v62 = vmul.f32 %v2207_v9, %v950_v27  ;;  %v1405_v9 = vrot.slane %v1404_v23, 1 }
 0x1d4   : > { %2214 = vrsqrt.f32 %v3439_v41  ;;  %v1099_v10 = vmul.f32 %v1037_v8, %v945_v15  ;;  %vm967_vm14 = vcmp.eq.f32.partialorder %v3416_v49, 0.0  ;;  %vm977_vm1 = vcmp.eq.f32.partialorder %v3439_v41, inf }
 0x1d5   : > { %v960_v24 = vmul.f32 %v2211_v12, %v959_v58  ;;  %v1042_v28 = vsub.f32 1.5, %v1041_v38  ;;  %v952_v52 = vmul.f32 %v951_v62, %v3384_v45  ;;  %v3472_v3 = vadd.f32 %v1405_v9, %v1404_v23 }
 0x1d6   : > { %v3447_v47 = vpop.eup %2212  ;;  %v3501_v22 = vmul.f32 %v1099_v10, %v2971_v20  ;;  %v980_v25 = vand.u32 2147483648, %v3439_v41  ;;  %vm979_vm4 = vcmp.eq.f32.partialorder %v3439_v41, 0.0 }
 0x1d7   : > { %v961_v56 = vmul.f32 0.5, %v960_v24  ;;  %1493 = vxpose.xlu1.b32.cont [6/8] (short) (narrow) %v3394_v48, 64  ;;  %v1049_v61 = vmul.f32 %v3447_v47, %v3431_v54  ;;  %v3455_v43 = vpop.xlane.xlu0 %911  ;;  %v1407_v37 = vmul.f32 %v3472_v3, %v3463_v33  ;;  %v1043_v31 = vmul.f32 %v3424_v63, %v1042_v28 }
 0x1d8   : > { %2216 = vrsqrt.f32 %v3455_v43  ;;  %v954_v44 = vsel %vm953_vm6, %v3384_v45, %v952_v52  ;;  %vm1055_vm13 = vweird.f32 %v3447_v47  ;;  %v1408_v23 = vmul.f32 %v3472_v3, %v3501_v22 }
 0x1d9   : > { %v1050_v17 = vmul.f32 %v3447_v47, %v1049_v61  ;;  %v962_v0 = vsub.f32 1.5, %v961_v56  ;;  %1982 = vmatmul.msk.f32.vlgmr.msrb.gmra.mxu3 %vm560_vm0, %v1407_v37  ;;  %v957_v24 = vsel %vm955_vm10, %v956_v18, %v954_v44  ;;  %vm3526_vm15 = vmor %vm1054_vm12, %vm1055_vm13  ;;  %vm1064_vm2 = vweird.f32 %v3455_v43 }
 0x1da   : > { %v2215_v48 = vpop.eup %2214  ;;  %v3516_v20 = vpop.f32.mrf.mxu2 }
 0x1db   : > { %v971_v29 = vmul.f32 %v2215_v48, %v3439_v41  ;;  %v3474_v6 = vpop.xlane.xlu2 %874  ;;  %v1051_v51 = vmul.f32 0.5, %v1050_v17  ;;  %v963_v2 = vmul.f32 %v2211_v12, %v962_v0  ;;  %v1047_v12 = vsel %vm3490_vm9, %v3424_v63, %v1043_v31 }
 0x1dc   : > { %2218 = vrsqrt.f32 %v3474_v6  ;;  %v1100_v63 = vmul.f32 %v1047_v12, %v957_v24  ;;  %vm989_vm6 = vcmp.eq.f32.partialorder %v3474_v6, inf  ;;  %v992_v15 = vand.u32 2147483648, %v3474_v6 }
 0x1dd   : > { %v972_v11 = vmul.f32 %v2215_v48, %v971_v29  ;;  %v1052_v46 = vsub.f32 1.5, %v1051_v51  ;;  %vm991_vm10 = vcmp.eq.f32.partialorder %v3474_v6, 0.0 }
 0x1de   : > { %v3486_v16 = vpop.eup %2216  ;;  %v3537_v0 = vmul.f32 %v1100_v63, %v2979_v30 }
 0x1df   : > { %v973_v27 = vmul.f32 0.5, %v972_v11  ;;  %1494 = vxpose.xlu1.b32.cont [7/8] (short) (narrow) %v3391_v59, 64  ;;  %v1059_v58 = vmul.f32 %v3486_v16, %v3455_v43  ;;  %v3498_v36 = vpop.xlane.xlu0 %914  ;;  %v964_v59 = vmul.f32 %v963_v2, %v3416_v49  ;;  %v1053_v61 = vmul.f32 %v3447_v47, %v1052_v46 }
 0x1e0   : > { %2220 = vrsqrt.f32 %v3498_v36  ;;  %vm1065_vm3 = vweird.f32 %v3486_v16  ;;  %v1409_v44 = vmul.f32 %v3472_v3, %v3537_v0  ;;  %vm1074_vm7 = vweird.f32 %v3498_v36 }
 0x1e1   : > { %v1060_v40 = vmul.f32 %v3486_v16, %v1059_v58  ;;  %v974_v38 = vsub.f32 1.5, %v973_v27  ;;  %v966_v54 = vsel %vm965_vm11, %v3416_v49, %v964_v59  ;;  %1983 = vmatmul.msk.f32.gmra.mxu3 %vm560_vm0, %v1408_v23  ;;  %vm3562_vm5 = vmor %vm1064_vm2, %vm1065_vm3 }
 0x1e2   : > { %v2219_v45 = vpop.eup %2218  ;;  %v969_v29 = vsel %vm967_vm14, %v968_v60, %v966_v54  ;;  %v3552_v30 = vpop.f32.mrf.mxu2 }
 0x1e3   : > { %v983_v5 = vmul.f32 %v2219_v45, %v3474_v6  ;;  %v3510_v62 = vpop.xlane.xlu2 %877  ;;  %v1061_v39 = vmul.f32 0.5, %v1060_v40  ;;  %v975_v8 = vmul.f32 %v2215_v48, %v974_v38  ;;  %v1057_v48 = vsel %vm3526_vm15, %v3447_v47, %v1053_v61 }
 0x1e4   : > { %2222 = vrsqrt.f32 %v3510_v62  ;;  %v1101_v47 = vmul.f32 %v1057_v48, %v969_v29  ;;  %vm1001_vm11 = vcmp.eq.f32.partialorder %v3510_v62, inf  ;;  %vm1003_vm14 = vcmp.eq.f32.partialorder %v3510_v62, 0.0 }
 0x1e5   : > { %v984_v56 = vmul.f32 %v2219_v45, %v983_v5  ;;  %v1062_v10 = vsub.f32 1.5, %v1061_v39 }
 0x1e6   : > { %v3522_v9 = vpop.eup %2220  ;;  %v3572_v38 = vmul.f32 %v1101_v47, %v2989_v42 }
 0x1e7   : > { %v985_v28 = vmul.f32 0.5, %v984_v56  ;;  %1495 = vxpose.xlu1.b32.end [8/8] (short) (narrow) %v3401_v32, 64  ;;  %v1069_v17 = vmul.f32 %v3522_v9, %v3498_v36  ;;  %v3534_v52 = vpop.xlane.xlu0 %917  ;;  %v976_v32 = vmul.f32 %v975_v8, %v3439_v41  ;;  %v1063_v2 = vmul.f32 %v3486_v16, %v1062_v10 }
 0x1e8   : > { %2224 = vrsqrt.f32 %v3534_v52  ;;  %vm1075_vm8 = vweird.f32 %v3522_v9  ;;  %vm1084_vm12 = vweird.f32 %v3534_v52 }
 0x1e9   : > { %v1070_v11 = vmul.f32 %v3522_v9, %v1069_v17  ;;  %v986_v37 = vsub.f32 1.5, %v985_v28  ;;  %v978_v43 = vsel %vm977_vm1, %v3439_v41, %v976_v32  ;;  %1984 = vmatmul.msk.f32.gmra.mxu3 %vm560_vm0, %v1409_v44  ;;  %v1067_v63 = vsel %vm3562_vm5, %v3486_v16, %v1063_v2  ;;  %vm3590_vm9 = vmor %vm1074_vm7, %vm1075_vm8 }
 0x1ea   : > { %v2223_v49 = vpop.eup %2222  ;;  %v981_v41 = vsel %vm979_vm4, %v980_v25, %v978_v43  ;;  %v782_v42 = vpop.f32.mrf.mxu2  ;;  %v1410_v16 = vmul.f32 %v3472_v3, %v3572_v38  ;;  %v1004_v2 = vand.u32 2147483648, %v3510_v62 }
 0x1eb   : > { %v995_v18 = vmul.f32 %v2223_v49, %v3510_v62  ;;  %v3546_v31 = vpop.xlane.xlu2 %880  ;;  %v1071_v27 = vmul.f32 0.5, %v1070_v11  ;;  %v987_v12 = vmul.f32 %v2219_v45, %v986_v37  ;;  %v1102_v39 = vmul.f32 %v1067_v63, %v981_v41 }
 0x1ec   : > { %2226 = vrsqrt.f32 %v3546_v31  ;;  %vm1013_vm1 = vcmp.eq.f32.partialorder %v3546_v31, inf  ;;  %vm1015_vm4 = vcmp.eq.f32.partialorder %v3546_v31, 0.0 }
 0x1ed   : > { %v996_v51 = vmul.f32 %v2223_v49, %v995_v18  ;;  %v1072_v45 = vsub.f32 1.5, %v1071_v27  ;;  %v988_v23 = vmul.f32 %v987_v12, %v3474_v6  ;;  %v3597_v32 = vmul.f32 %v1102_v39, %v2998_v57 }
 0x1ee   : > { %v3558_v58 = vpop.eup %2224 }
 0x1ef   : > { %v997_v46 = vmul.f32 0.5, %v996_v51  ;;  %v1079_v40 = vmul.f32 %v3558_v58, %v3534_v52  ;;  %v3569_v59 = vpop.xlane.xlu0 %920  ;;  %v1073_v8 = vmul.f32 %v3522_v9, %v1072_v45  ;;  %v990_v29 = vsel %vm989_vm6, %v3474_v6, %v988_v23 }
 0x1f0   : > { %2228 = vrsqrt.f32 %v3569_v59  ;;  %v993_v37 = vsel %vm991_vm10, %v992_v15, %v990_v29  ;;  %vm1085_vm13 = vweird.f32 %v3558_v58  ;;  %v1411_v57 = vmul.f32 %v3472_v3, %v3597_v32 }
 0x1f1   : > { %v1080_v56 = vmul.f32 %v3558_v58, %v1079_v40  ;;  %v998_v60 = vsub.f32 1.5, %v997_v46  ;;  %1985 = vmatmul.msk.f32.gmra.mxu3 %vm560_vm0, %v1410_v16  ;;  %v1077_v18 = vsel %vm3590_vm9, %v3522_v9, %v1073_v8  ;;  %vm1086_vm15 = vmor %vm1084_vm12, %vm1085_vm13  ;;  %vm1094_vm2 = vweird.f32 %v3569_v59 }
 0x1f2   : > { %v2227_v5 = vpop.eup %2226  ;;  %v1103_v25 = vmul.f32 %v1077_v18, %v993_v37 }
 0x1f3   : > { %v1007_v61 = vmul.f32 %v2227_v5, %v3546_v31  ;;  %v1081_v28 = vmul.f32 0.5, %v1080_v56  ;;  %v999_v48 = vmul.f32 %v2223_v49, %v998_v60  ;;  %v785_v49 = vpop.f32.mrf.mxu2 }
 0x1f4   : > { %1552 = vmatpush.msrb.mxu0 %v785_v49  ;;  %v3614_v52 = vmul.f32 %v1103_v25, %v3007_v50 }
 0x1f5   : > { %v1008_v54 = vmul.f32 %v2227_v5, %v1007_v61  ;;  %v1082_v47 = vsub.f32 1.5, %v1081_v28  ;;  %v1000_v51 = vmul.f32 %v999_v48, %v3510_v62 }
 0x1f6   : > { %v2229_v17 = vpop.eup %2228  ;;  %1553 = vmatpush.msrb.mxu0 %v782_v42  ;;  %v1412_v50 = vmul.f32 %v3472_v3, %v3614_v52 }
 0x1f7   : > { %v1009_v10 = vmul.f32 0.5, %v1008_v54  ;;  %v1089_v11 = vmul.f32 %v2229_v17, %v3569_v59  ;;  %v1083_v9 = vmul.f32 %v3558_v58, %v1082_v47  ;;  %v1002_v43 = vsel %vm1001_vm11, %v3510_v62, %v1000_v51 }
 0x1f8   : > { %1554 = vmatpush.msrb.mxu0 %v3552_v30  ;;  %v1005_v12 = vsel %vm1003_vm14, %v1004_v2, %v1002_v43  ;;  %vm1095_vm3 = vweird.f32 %v2229_v17  ;;  %v1016_v30 = vand.u32 2147483648, %v3546_v31 }
 0x1f9   : > { %v1090_v6 = vmul.f32 %v2229_v17, %v1089_v11  ;;  %v1010_v44 = vsub.f32 1.5, %v1009_v10  ;;  %1986 = vmatmul.msk.f32.gmra.mxu3 %vm560_vm0, %v1411_v57  ;;  %v1087_v46 = vsel %vm1086_vm15, %v3558_v58, %v1083_v9  ;;  %vm1096_vm5 = vmor %vm1094_vm2, %vm1095_vm3 }
 0x1fa   : > { %1555 = vmatpush.msrb.mxu0 %v3516_v20  ;;  %v1104_v62 = vmul.f32 %v1087_v46, %v1005_v12 }
 0x1fb   : > { %v1091_v27 = vmul.f32 0.5, %v1090_v6  ;;  %v1011_v24 = vmul.f32 %v2227_v5, %v1010_v44 }
 0x1fc   : > { %1556 = vmatpush.msrb.mxu0 %v3480_v53  ;;  %v3631_v20 = vmul.f32 %v1104_v62, %v3016_v13 }
 0x1fd   : > { %v1092_v40 = vsub.f32 1.5, %v1091_v27  ;;  %v1012_v41 = vmul.f32 %v1011_v24, %v3546_v31 }
 0x1fe   : > { %1557 = vmatpush.msrb.mxu0 %v3442_v35  ;;  %v1413_v53 = vmul.f32 %v3472_v3, %v3631_v20 }
 0x1ff   : > { %v1093_v5 = vmul.f32 %v2229_v17, %v1092_v40  ;;  %v1014_v58 = vsel %vm1013_vm1, %v3546_v31, %v1012_v41 }
 0x200   : > { %v1017_v59 = vsel %vm1015_vm4, %v1016_v30, %v1014_v58 }
 0x201   : > { %1987 = vmatmul.msk.f32.gmra.mxu3 %vm560_vm0, %v1412_v50  ;;  %v1097_v63 = vsel %vm1096_vm5, %v2229_v17, %v1093_v5 }
 0x202   : > { %v1105_v45 = vmul.f32 %v1097_v63, %v1017_v59 }
 0x204   : > { %v3637_v56 = vmul.f32 %v1105_v45, %v3024_v21 }
 0x206   : > { %v1414_v31 = vmul.f32 %v3472_v3, %v3637_v56 }
 0x209   : > { %1988 = vmatmul.msk.f32.gmra.mxu3 %vm560_vm0, %v1413_v53 }
 0x211   : > { %1989 = vmatmul.msk.f32.gmra.mxu3 %vm560_vm0, %v1414_v31 }
 0x214   : > { %v764_v35 = vpop.f32.mrf.mxu0 }
 0x221   : > { %v767_v23 = vpop.f32.mrf.mxu0 }
 0x222   : > { %1558 = vmatpush.msrb.mxu0 %v767_v23 }
 0x224   : > { %1559 = vmatpush.msrb.mxu0 %v764_v35 }
 0x253   : > { %v1504_v13 = vpop.trf.xlu1 }
 0x254   : > { %1990 = vmatmul.msk.f32.vlgmr.msrb.gmra.mxu0 %vm560_vm0, %v1504_v13 }
 0x25b   : > { %v1505_v60 = vpop.trf.xlu1 }
 0x25c   : > { %1991 = vmatmul.msk.f32.gmra.mxu0 %vm560_vm0, %v1505_v60 }
 0x263   : > { %v1506_v61 = vpop.trf.xlu1 }
 0x264   : > { %1992 = vmatmul.msk.f32.gmra.mxu0 %vm560_vm0, %v1506_v61 }
 0x26b   : > { %v1507_v21 = vpop.trf.xlu1 }
 0x26c   : > { %1993 = vmatmul.msk.f32.gmra.mxu0 %vm560_vm0, %v1507_v21 }
 0x273   : > { %v1508_v42 = vpop.trf.xlu1 }
 0x274   : > { %1994 = vmatmul.msk.f32.gmra.mxu0 %vm560_vm0, %v1508_v42 }
 0x27b   : > { %v1509_v3 = vpop.trf.xlu1 }
 0x27c   : > { %1995 = vmatmul.msk.f32.gmra.mxu0 %vm560_vm0, %v1509_v3 }
 0x283   : > { %v1510_v39 = vpop.trf.xlu1 }
 0x284   : > { %1996 = vmatmul.msk.f32.gmra.mxu0 %vm560_vm0, %v1510_v39 }
 0x28b   : > { %v1511_v54 = vpop.trf.xlu1 }
 0x28c   : > { %1997 = vmatmul.msk.f32.gmra.mxu0 %vm560_vm0, %v1511_v54 }
 0x2d1   : > { %v1561_v16 = vpop.f32.mrf.mxu0 }
 0x2d9   : > { %v1564_v15 = vpop.f32.mrf.mxu0 }
 0x2da   : > { %v1586_v51 = vmul.f32 %v1564_v15, %v3333_v4  ;;  %v1668_v4 = vld [vmem:[#allocation14 + $0x10] sm:$0xff] }
 0x2e1   : > { %v1567_v8 = vpop.f32.mrf.mxu0 }
 0x2e2   : > { %v1587_v6 = vmul.f32 %v1567_v8, %v3301_v34  ;;  %v1669_v34 = vld [vmem:[#allocation14 + $0x18] sm:$0xff] }
 0x2e9   : > { %v1570_v28 = vpop.f32.mrf.mxu0 }
 0x2ea   : > { %v1588_v47 = vmul.f32 %v1570_v28, %v3276_v55  ;;  %v1670_v55 = vld [vmem:[#allocation14 + $0x20] sm:$0xff] }
 0x2f1   : > { %v1573_v17 = vpop.f32.mrf.mxu0 }
 0x2f2   : > { %v1589_v18 = vmul.f32 %v1573_v17, %v3255_v14  ;;  %v1671_v14 = vld [vmem:[#allocation14 + $0x28] sm:$0xff] }
 0x2f9   : > { %v1576_v29 = vpop.f32.mrf.mxu0 }
 0x2fa   : > { %v1590_v37 = vmul.f32 %v1576_v29, %v3245_v1  ;;  %v1672_v1 = vld [vmem:[#allocation14 + $0x30] sm:$0xff] }
 0x301   : > { %v1579_v36 = vpop.f32.mrf.mxu0 }
 0x302   : > { %v1591_v11 = vmul.f32 %v1579_v36, %v3225_v26  ;;  %v1673_v26 = vld [vmem:[#allocation14 + $0x38] sm:$0xff] }
 0x303   : > { %1710 = vmatpush.msrb.mxu2 %v1673_v26 }
 0x305   : > { %1711 = vmatpush.msrb.mxu2 %v1672_v1 }
 0x307   : > { %1712 = vmatpush.msrb.mxu2 %v1671_v14 }
 0x309   : > { %v1582_v48 = vpop.f32.mrf.mxu0  ;;  %1713 = vmatpush.msrb.mxu2 %v1670_v55 }
 0x30a   : > { %v1592_v10 = vmul.f32 %v1582_v48, %v3212_v7  ;;  %v1585_v7 = vmul.f32 %v1561_v16, %v3357_v19  ;;  %v1667_v19 = vld [vmem:[#allocation14 + $0x8] sm:$0xff]  ;;  %v2159_v16 = vld [vmem:[%s3736_s9] ss:$0 sm:$0xff] }
 0x30b   : > { %1714 = vmatpush.msrb.mxu2 %v1669_v34 }
 0x30c   : > { %1625 = vmatpush.msrb.mxu1 %v1592_v10 }
 0x30d   : > { %1715 = vmatpush.msrb.mxu2 %v1668_v4 }
 0x30e   : > { %1626 = vmatpush.msrb.mxu1 %v1591_v11 }
 0x30f   : > { %1716 = vmatpush.msrb.mxu2 %v1667_v19 }
 0x310   : > { %1627 = vmatpush.msrb.mxu1 %v1590_v37 }
 0x312   : > { %1628 = vmatpush.msrb.mxu1 %v1589_v18 }
 0x314   : > { %1629 = vmatpush.msrb.mxu1 %v1588_v47 }
 0x316   : > { %1630 = vmatpush.msrb.mxu1 %v1587_v6 }
 0x318   : > { %1631 = vmatpush.msrb.mxu1 %v1586_v51 }
 0x31a   : > { %1632 = vmatpush.msrb.mxu1 %v1585_v7 }
 0x31b   : > { %1998 = vmatmul.msk.f32.vlgmr.msrb.gmra.mxu1 %vm560_vm0, %v3463_v33  ;;  %v1666_v33 = vld [vmem:[#allocation14] sm:$0xff] }
 0x31c   : > { %1717 = vmatpush.msrb.mxu2 %v1666_v33 }
 0x323   : > { %1999 = vmatmul.msk.f32.gmra.mxu1 %vm560_vm0, %v3501_v22  ;;  %v1456_v22 = vpop.f32.mrf.mxu3 }
 0x32b   : > { %2000 = vmatmul.msk.f32.gmra.mxu1 %vm560_vm0, %v3537_v0  ;;  %v1459_v0 = vpop.f32.mrf.mxu3 }
 0x32c   : > { %v1460_v44 = vadd.f32 1e-06, %v1459_v0 }
 0x333   : > { %2001 = vmatmul.msk.f32.gmra.mxu1 %vm560_vm0, %v3572_v38  ;;  %v1457_v38 = vadd.f32 1e-06, %v1456_v22 }
 0x335   : > { %2230 = vrcp.f32 %v1457_v38 }
 0x336   : > { %2232 = vrcp.f32 %v1460_v44 }
 0x33b   : > { %2002 = vmatmul.msk.f32.gmra.mxu1 %vm560_vm0, %v3597_v32  ;;  %v1462_v32 = vpop.f32.mrf.mxu3  ;;  %v2231_v49 = vpop.eup %2230 }
 0x33c   : > { %v1463_v9 = vadd.f32 1e-06, %v1462_v32  ;;  %v2233_v27 = vpop.eup %2232 }
 0x33e   : > { %2234 = vrcp.f32 %v1463_v9 }
 0x343   : > { %2003 = vmatmul.msk.f32.gmra.mxu1 %vm560_vm0, %v3614_v52  ;;  %v1465_v2 = vpop.f32.mrf.mxu3 }
 0x344   : > { %v1466_v12 = vadd.f32 1e-06, %v1465_v2  ;;  %v2235_v46 = vpop.eup %2234 }
 0x346   : > { %2236 = vrcp.f32 %v1466_v12 }
 0x34b   : > { %2004 = vmatmul.msk.f32.gmra.mxu1 %vm560_vm0, %v3631_v20  ;;  %v1468_v52 = vpop.f32.mrf.mxu3 }
 0x34c   : > { %v1469_v62 = vadd.f32 1e-06, %v1468_v52  ;;  %v2237_v30 = vpop.eup %2236 }
 0x34e   : > { %2238 = vrcp.f32 %v1469_v62 }
 0x353   : > { %2005 = vmatmul.msk.f32.gmra.mxu1 %vm560_vm0, %v3637_v56  ;;  %v1471_v50 = vpop.f32.mrf.mxu3 }
 0x354   : > { %v1472_v20 = vadd.f32 1e-06, %v1471_v50  ;;  %v2239_v59 = vpop.eup %2238 }
 0x356   : > { %2240 = vrcp.f32 %v1472_v20 }
 0x35b   : > { %v1474_v45 = vpop.f32.mrf.mxu3 }
 0x35c   : > { %v1475_v56 = vadd.f32 1e-06, %v1474_v45  ;;  %v2241_v31 = vpop.eup %2240 }
 0x35e   : > { %2242 = vrcp.f32 %v1475_v56 }
 0x363   : > { %v1477_v13 = vpop.f32.mrf.mxu3 }
 0x364   : > { %v1478_v60 = vadd.f32 1e-06, %v1477_v13  ;;  %v2243_v61 = vpop.eup %2242 }
 0x366   : > { %2244 = vrcp.f32 %v1478_v60 }
 0x36c   : > { %v2245_v3 = vpop.eup %2244 }
 0x398   : > { %v1634_v25 = vpop.f32.mrf.mxu1 }
 0x399   : > { %v1658_v57 = vmul.f32 %v2231_v49, %v1634_v25 }
 0x39b   : > { %2006 = vmatmul.msk.f32.vlgmr.msrb.gmra.mxu2 %vm560_vm0, %v1658_v57 }
 0x3a0   : > { %v1637_v43 = vpop.f32.mrf.mxu1 }
 0x3a1   : > { %v1659_v24 = vmul.f32 %v2233_v27, %v1637_v43 }
 0x3a3   : > { %2007 = vmatmul.msk.f32.gmra.mxu2 %vm560_vm0, %v1659_v24 }
 0x3a8   : > { %v1640_v40 = vpop.f32.mrf.mxu1 }
 0x3a9   : > { %v1660_v41 = vmul.f32 %v2235_v46, %v1640_v40 }
 0x3ab   : > { %2008 = vmatmul.msk.f32.gmra.mxu2 %vm560_vm0, %v1660_v41 }
 0x3b0   : > { %v1643_v5 = vpop.f32.mrf.mxu1 }
 0x3b1   : > { %v1661_v58 = vmul.f32 %v2237_v30, %v1643_v5 }
 0x3b3   : > { %2009 = vmatmul.msk.f32.gmra.mxu2 %vm560_vm0, %v1661_v58 }
 0x3b8   : > { %v1646_v63 = vpop.f32.mrf.mxu1 }
 0x3b9   : > { %v1662_v53 = vmul.f32 %v2239_v59, %v1646_v63 }
 0x3bb   : > { %2010 = vmatmul.msk.f32.gmra.mxu2 %vm560_vm0, %v1662_v53 }
 0x3c0   : > { %v1649_v35 = vpop.f32.mrf.mxu1 }
 0x3c1   : > { %v1663_v23 = vmul.f32 %v2241_v31, %v1649_v35 }
 0x3c3   : > { %2011 = vmatmul.msk.f32.gmra.mxu2 %vm560_vm0, %v1663_v23 }
 0x3c8   : > { %v1652_v21 = vpop.f32.mrf.mxu1 }
 0x3c9   : > { %v1664_v42 = vmul.f32 %v2243_v61, %v1652_v21 }
 0x3cb   : > { %2012 = vmatmul.msk.f32.gmra.mxu2 %vm560_vm0, %v1664_v42 }
 0x3d0   : > { %v1655_v39 = vpop.f32.mrf.mxu1 }
 0x3d1   : > { %v1665_v54 = vmul.f32 %v2245_v3, %v1655_v39 }
 0x3d3   : > { %2013 = vmatmul.msk.f32.gmra.mxu2 %vm560_vm0, %v1665_v54 }
 0x41e   : > { %v1719_v15 = vpop.f32.mrf.mxu2 }
 0x41f   : > { %v1720_v8 = vadd.f32 %v2159_v16, %v1719_v15 }
 0x421   : > { %1743 = vst.msk [vmem:[%s543_s30] sm:$0xff] %vm560_vm0, %v1720_v8 }
 0x426   : > { %v1722_v28 = vpop.f32.mrf.mxu2 }
 0x427   : > { %v1723_v17 = vadd.f32 %v2159_v16, %v1722_v28 }
 0x429   : > { %1744 = vst.msk [vmem:[%s543_s30 + $0x8] sm:$0xff] %vm560_vm0, %v1723_v17 }
 0x42e   : > { %v1725_v29 = vpop.f32.mrf.mxu2 }
 0x42f   : > { %v1726_v36 = vadd.f32 %v2159_v16, %v1725_v29 }
 0x431   : > { %1745 = vst.msk [vmem:[%s543_s30 + $0x10] sm:$0xff] %vm560_vm0, %v1726_v36 }
 0x436   : > { %v1728_v48 = vpop.f32.mrf.mxu2 }
 0x437   : > { %v1729_v10 = vadd.f32 %v2159_v16, %v1728_v48 }
 0x439   : > { %1746 = vst.msk [vmem:[%s543_s30 + $0x18] sm:$0xff] %vm560_vm0, %v1729_v10 }
 0x43e   : > { %v1731_v11 = vpop.f32.mrf.mxu2 }
 0x43f   : > { %v1732_v37 = vadd.f32 %v2159_v16, %v1731_v11 }
 0x441   : > { %1747 = vst.msk [vmem:[%s543_s30 + $0x20] sm:$0xff] %vm560_vm0, %v1732_v37 }
 0x446   : > { %v1734_v18 = vpop.f32.mrf.mxu2 }
 0x447   : > { %v1735_v47 = vadd.f32 %v2159_v16, %v1734_v18 }
 0x449   : > { %1748 = vst.msk [vmem:[%s543_s30 + $0x28] sm:$0xff] %vm560_vm0, %v1735_v47 }
 0x44e   : > { %v1737_v6 = vpop.f32.mrf.mxu2 }
 0x44f   : > { %v1738_v51 = vadd.f32 %v2159_v16, %v1737_v6 }
 0x451   : > { %1749 = vst.msk [vmem:[%s543_s30 + $0x30] sm:$0xff] %vm560_vm0, %v1738_v51 }
 0x456   : > { %v1740_v7 = vpop.f32.mrf.mxu2 }
 0x457   : > { %v1741_v26 = vadd.f32 %v2159_v16, %v1740_v7 }
 0x459   : > { %1750 = vst.msk [vmem:[%s543_s30 + $0x38] sm:$0xff] %vm560_vm0, %v1741_v26 }
 0x45a   : > { %2513 = shalt.err (!%p2510_p4)
}
 0x45b   : > { %s2577_s26 = smov 128   ;;  %s2578_s18 = smov 8  }
 0x45c   : > { %2073 = dma.vmem_to_hbm [thread:$0]  (%p2704_p12), %s1765_s3, 1024, %s1767_s16, %s1752_s5, %s2577_s26, %s2577_s26, %s2578_s18  }
 0x45d PF: > { %s3804_s24 = sld [smem:[#allocation23_spill]] }
 0x45e   : > { %s3806_s23 = sld [smem:[#allocation24_spill]] }
 0x463   : > { %s1781_s27 = sand.u32 1, %s3804_s24  }
 0x464   : > { %p3807_p2 = scmp.ge.s32.totalorder %s3806_s23, 2  ;;  %s1782_s30 = scalar_lea.sflag [#allocation4], %s1781_s27 }
 0x466   : > { %p2102_p9 = pnand %p3807_p2, %p2722_p6 }
 0x468   : > { %p2103_p3 = pneg %p2102_p9 }
 0x46a   : > { %2551 = dma.done.wait (%p2103_p3), %s1782_s30, 1024  }
 0x46b   : > { %2553 = vsyncadd (%p2103_p3), %s1782_s30, 4294966272  ;;  %s3808_s16 = sld [smem:[#allocation25_spill]]  ;;  %s3810_s13 = smov %s2560_s14 }
 0x46c   : > { %s3809_s10 = sld [smem:[#allocation26_spill]]  ;;  %s3811_s14 = smov %s2564_s15 }
 0x471   : > { %p29_p5 = scmp.ge.s32.totalorder %s3808_s16, 4  }
 0x472   : > { %s3812_s15 = smov %s3809_s10 }
 0x473   :  { %31 = sbr.rel (!%p29_p5) target bundleno = 16 (0x10), region = 149 }
 0x478   :  { %1788 = vsyncpa [#allocation3], 1 }
 0x479   :  { %1790 = vsyncpa [#allocation3 + $0x1], 1 }
 0x47a   :  { %1791 = vsyncpa [#allocation6], 1 }
 0x47b   :  { %1793 = vsyncpa [#allocation6 + $0x1], 1 }
 0x47c   :  { %1794 = vsyncpa [#allocation9], 1 }
 0x47d   :  { %1795 = vsyncpa [#allocation12], 1 }
 0x47e   :  { %1796 = vsyncpa [#allocation15], 1 }
 0x47f   :  { %1797 = vsyncpa [#allocation4], 1 }
 0x480   :  { %1799 = vsyncpa [#allocation4 + $0x1], 1 }

</bundles_post_ra>
